<compile_context>
chip_gen: v7x
topology: tpu7x:2x2x1
jax: 0.10.0
libtpu: 0.0.40
codegen_flags: <defaults>
</compile_context>

<pallas_src>
import math

import jax
import jax.numpy as jnp
from jax import lax
from jax.experimental import pallas as pl
from jax.experimental.pallas import tpu as pltpu

# ----- model hyper-parameters (small synthetic config) -----
D = 32            # embedding_dim
H = 4             # attention heads
HD = D // H       # head dim
F = 64            # FFN hidden dim (ResidualMLP hidden)
NUM_LAYERS = 2
EPS = 1e-5        # nn.LayerNorm default eps
NEG_INF = -1e30   # finite mask fill (avoids NaN when a row has no valid key)

# ----- numerics flags (gated per performance review) -----
USE_BF16_MATMULS = False      # bf16 MXU operands, f32 accumulation (prod lever; off for parity)
APPROX_SOFTMAX_RECIP = True   # EUP vrcp for softmax denom (~1e-3 rel err; exact path for parity tests)
USE_TANH_GELU = False         # tanh-approx GELU (EUP) instead of exact erf (VALU poly); v5e option


def _erf(x):
    # Abramowitz & Stegun 7.1.26 (exp + polynomial only; max abs err ~1.5e-7),
    # used because lax.erf has no guaranteed Mosaic lowering.
    a1, a2, a3, a4, a5 = (0.254829592, -0.284496736, 1.421413741,
                          -1.453152027, 1.061405429)
    p = 0.3275911
    s = jnp.where(x >= 0.0, 1.0, -1.0)
    ax = jnp.abs(x)
    t = 1.0 / (1.0 + p * ax)
    poly = ((((a5 * t + a4) * t + a3) * t + a2) * t + a1) * t
    return s * (1.0 - poly * jnp.exp(-ax * ax))


def _gelu(x):
    if USE_TANH_GELU:
        # tanh approximation: moves most of the work to the otherwise idle EUP slot.
        c = math.sqrt(2.0 / math.pi)
        return 0.5 * x * (1.0 + jnp.tanh(c * (x + 0.044715 * x * x * x)))
    # exact GeLU: x * 0.5 * (1 + erf(x / sqrt(2)))  -- matches pytext nn.GELU
    return x * 0.5 * (1.0 + _erf(x * (1.0 / math.sqrt(2.0))))


def _layer_norm(x, w, b):
    mu = jnp.mean(x, axis=-1, keepdims=True)
    xc = x - mu
    var = jnp.mean(xc * xc, axis=-1, keepdims=True)
    return xc * lax.rsqrt(var + EPS) * w + b


def _mm_in(x):
    return x.astype(jnp.bfloat16) if USE_BF16_MATMULS else x


def _dot(a, b):
    return jnp.dot(_mm_in(a), _mm_in(b), preferred_element_type=jnp.float32)


def _bdot(a, b, dnums):
    return lax.dot_general(_mm_in(a), _mm_in(b), dimension_numbers=dnums,
                           preferred_element_type=jnp.float32)


def _make_stack_kernel(n_rows, batch):
    """Kernel closure over the static row count N = seq*batch and batch size."""
    pow2 = (batch & (batch - 1)) == 0

    def batch_ids(dim):
        ids = lax.broadcasted_iota(jnp.int32, (n_rows, n_rows), dim)
        if pow2:
            return jnp.bitwise_and(ids, batch - 1)     # row r -> batch r % B
        return lax.rem(ids, jnp.int32(batch))

    def kernel(keypad_ref, x0_ref,
               wqkv_ref, bqkv_ref, wo_ref, bo_ref,
               ln1w_ref, ln1b_ref,
               w1_ref, b1_ref, w2_ref, b2_ref,
               ln2w_ref, ln2b_ref,
               out_ref, x_scr, bias_scr):
        layer = pl.program_id(0)

        @pl.when(layer == 0)
        def _():
            # Activation starts as the flattened input; the additive attention
            # bias (block-diagonal batch separation + key padding) is rebuilt
            # in-kernel from a [1, N] row -> O(N) HBM traffic instead of an
            # O(N^2) precomputed array, and computed only once.
            x_scr[...] = x0_ref[...]
            cross = batch_ids(0) != batch_ids(1)
            bias_scr[...] = jnp.where(cross, NEG_INF, 0.0) + keypad_ref[...]

        x = x_scr[...]          # [N, D]   activation resident in VMEM across layers
        bias = bias_scr[...]    # [N, N]

        # ---- fused QKV projection (q scale already folded into the weights) ----
        qkv = _dot(x, wqkv_ref[...]) + bqkv_ref[...]          # [N, 3D]
        q = qkv[:, 0:D]
        k = qkv[:, D:2 * D]
        v = qkv[:, 2 * D:3 * D]

        # ---- all heads at once: stacked [H, N, HD] layout, one softmax ----
        q3 = jnp.stack([q[:, h * HD:(h + 1) * HD] for h in range(H)], axis=0)
        k3 = jnp.stack([k[:, h * HD:(h + 1) * HD] for h in range(H)], axis=0)
        v3 = jnp.stack([v[:, h * HD:(h + 1) * HD] for h in range(H)], axis=0)

        scores = _bdot(q3, k3, (((2,), (2,)), ((0,), (0,)))) + bias[None]   # [H, N, N]
        m = jnp.max(scores, axis=-1, keepdims=True)
        p = jnp.exp(scores - m)
        denom = jnp.sum(p, axis=-1, keepdims=True)
        if APPROX_SOFTMAX_RECIP:
            p = p * pl.reciprocal(denom, approx=True)
        else:
            p = p / denom
        ctx = _bdot(p, v3, (((2,), (1,)), ((0,), (0,))))      # [H, N, HD]

        # ---- output projection: batched per-head matmul + reduce over heads,
        #      all register-resident (no VMEM scratch round trip) ----
        wo3 = wo_ref[...].reshape(H, HD, D)                   # sublane-split, free
        attn = jnp.sum(_bdot(ctx, wo3, (((2,), (1,)), ((0,), (0,)))), axis=0)
        attn = attn + bo_ref[...]                             # [N, D]

        # ---- residual + attention LayerNorm (post-norm) ----
        x1 = _layer_norm(x + attn, ln1w_ref[...], ln1b_ref[...])

        # ---- ResidualMLP: x1 + Linear2(gelu(Linear1(x1))) ----
        h1 = _gelu(_dot(x1, w1_ref[...]) + b1_ref[...])
        x2 = x1 + _dot(h1, w2_ref[...]) + b2_ref[...]

        # ---- final LayerNorm ----
        x_new = _layer_norm(x2, ln2w_ref[...], ln2b_ref[...])
        x_scr[...] = x_new        # carry to next layer (stays in VMEM)
        out_ref[...] = x_new      # per-layer state output block

    return kernel


def transformer_stack(x_flat, key_pad_row, stacked_params, batch):
    """Run the fused layer stack.

    x_flat:       [N, D]  (N = seq*batch, row r = (seq r//B, batch r%B))
    key_pad_row:  [1, N]  additive (0 / NEG_INF) key-padding row
    stacked_params: tuple of per-layer weights stacked along a leading L axis.
    """
    n_rows = x_flat.shape[0]
    num_layers = stacked_params[0].shape[0]

    def w_spec(per_layer_shape):
        nd = len(per_layer_shape)
        # Leading layer dim squeezed; Pallas double-buffers the per-layer DMA.
        return pl.BlockSpec((None,) + tuple(per_layer_shape),
                            lambda l: (l,) + (0,) * nd)

    in_specs = [
        pl.BlockSpec((1, n_rows), lambda l: (0, 0)),          # key-padding row
        pl.BlockSpec((n_rows, D), lambda l: (0, 0)),          # initial activation
    ] + [w_spec(p.shape[1:]) for p in stacked_params]

    grid_spec = pltpu.PrefetchScalarGridSpec(
        num_scalar_prefetch=0,
        grid=(num_layers,),
        in_specs=in_specs,
        out_specs=pl.BlockSpec((None, n_rows, D), lambda l: (l, 0, 0)),
        scratch_shapes=[
            pltpu.VMEM((n_rows, D), jnp.float32),             # carried activation
            pltpu.VMEM((n_rows, n_rows), jnp.float32),        # attention bias (built once)
        ],
    )
    return pl.pallas_call(
        _make_stack_kernel(n_rows, batch),
        out_shape=jax.ShapeDtypeStruct((num_layers, n_rows, D), jnp.float32),
        grid_spec=grid_spec,
        compiler_params=pltpu.CompilerParams(
            # Layer axis is a sequential carry -> "arbitrary".
            dimension_semantics=("arbitrary",),
            # Footprint: ~2 layers of weights + activation + O(N^2) bias; fits
            # comfortably inside the 32 MiB scoped budget on v5e/v6e/v7x.
            vmem_limit_bytes=32 * 1024 * 1024,
        ),
    )(key_pad_row, x_flat, *stacked_params)


def accelerator_transformer_layers(encoded, padding_mask, stacked_params):
    """Forward pass of AcceleratorTransformerLayers.

    encoded:      [S, B, D] float32
    padding_mask: [B, S]    bool (True = padded)
    Returns the list of states, each [S, B, D] (input + output of each layer).
    """
    S, B, D_ = encoded.shape
    N = S * B
    # Row r of x_flat = (seq r // B, batch r % B). Pure view, no transpose.
    x_flat = encoded.reshape(N, D_)

    # Only an O(N) key-padding row leaves the wrapper; the O(N^2) bias is
    # rebuilt inside the kernel.  Key j flattens to (seq j//B, batch j%B).
    key_pad_bool = jnp.transpose(padding_mask).reshape(1, N)
    key_pad_row = jnp.where(key_pad_bool, NEG_INF, 0.0).astype(jnp.float32)

    out = transformer_stack(x_flat, key_pad_row, stacked_params, B)   # [L, N, D]
    num_layers = out.shape[0]
    out_sbd = out.reshape(num_layers, S, B, D_)                       # free view

    states = [encoded] + [out_sbd[l] for l in range(num_layers)]
    return states
    # TODO(synk): torch_glow / NNPI export machinery (input-spec generation) is
    # export-only glue with no runtime compute and is not translated; dropout
    # layers are identity at inference.


def init_layer_params(key):
    ks = jax.random.split(key, 6)
    scale = 0.02
    wqkv = jax.random.normal(ks[0], (3 * D, D), jnp.float32) * scale  # Linear(D,3D)
    bqkv = jnp.zeros((1, 3 * D), jnp.float32)
    # Fold the pytext q scale (head_dim ** -0.5) into the Q projection weight
    # and bias at init time: one-time weight transform, removes a per-layer
    # VPU multiply + lane-subslice rewrite in the kernel.
    qscale = HD ** -0.5
    wqkv = wqkv.at[0:D, :].multiply(qscale)
    bqkv = bqkv.at[:, 0:D].multiply(qscale)

    wo = jax.random.normal(ks[1], (D, D), jnp.float32) * scale        # Linear(D,D)
    bo = jnp.zeros((1, D), jnp.float32)
    ln1w = jnp.ones((1, D), jnp.float32)
    ln1b = jnp.zeros((1, D), jnp.float32)
    w1 = jax.random.normal(ks[2], (F, D), jnp.float32) * scale        # Linear(D,F)
    b1 = jax.random.normal(ks[3], (1, F), jnp.float32) * scale
    w2 = jax.random.normal(ks[4], (D, F), jnp.float32) * scale        # Linear(F,D)
    b2 = jax.random.normal(ks[5], (1, D), jnp.float32) * scale
    ln2w = jnp.ones((1, D), jnp.float32)
    ln2b = jnp.zeros((1, D), jnp.float32)
    # Store matmul weights pre-transposed so the kernel computes x @ W.
    return (wqkv.T, bqkv, wo.T, bo, ln1w, ln1b,
            w1.T, b1, w2.T, b2, ln2w, ln2b)


def init_stacked_params(key, num_layers):
    per_layer = [init_layer_params(k) for k in jax.random.split(key, num_layers)]
    n = len(per_layer[0])
    return tuple(jnp.stack([pl_[i] for pl_ in per_layer], axis=0) for i in range(n))


if __name__ == "__main__":
    S, B = 8, 2
    key = jax.random.PRNGKey(0)
    k_x, k_p = jax.random.split(key)

    # encoded: [seq_len, batch, embedding_dim] as the PyTorch module expects
    encoded = jax.random.normal(k_x, (S, B, D), jnp.float32)
    # padding_mask: [batch, seq_len] bool, True = padded position
    lengths = jnp.array([S, S - 2])
    padding_mask = jnp.arange(S)[None, :] >= lengths[:, None]   # [B, S]

    stacked_params = init_stacked_params(k_p, NUM_LAYERS)

    states = accelerator_transformer_layers(encoded, padding_mask, stacked_params)
    states = [jax.block_until_ready(s) for s in states]

    assert len(states) == NUM_LAYERS + 1
    for s in states:
        assert s.shape == (S, B, D) and s.dtype == jnp.float32
        assert bool(jnp.all(jnp.isfinite(s)))
    print("KERNEL_OK")
</pallas_src>

<mosaic_0001>
module attributes {stable_mosaic.version = 11 : i64} {
  func.func @kernel(%arg0: i32, %arg1: memref<1x16xf32, #tpu.memory_space<vmem>>, %arg2: memref<16x32xf32, #tpu.memory_space<vmem>>, %arg3: memref<1x32x96xf32, #tpu.memory_space<vmem>>, %arg4: memref<1x1x96xf32, #tpu.memory_space<vmem>>, %arg5: memref<1x32x32xf32, #tpu.memory_space<vmem>>, %arg6: memref<1x1x32xf32, #tpu.memory_space<vmem>>, %arg7: memref<1x1x32xf32, #tpu.memory_space<vmem>>, %arg8: memref<1x1x32xf32, #tpu.memory_space<vmem>>, %arg9: memref<1x32x64xf32, #tpu.memory_space<vmem>>, %arg10: memref<1x1x64xf32, #tpu.memory_space<vmem>>, %arg11: memref<1x64x32xf32, #tpu.memory_space<vmem>>, %arg12: memref<1x1x32xf32, #tpu.memory_space<vmem>>, %arg13: memref<1x1x32xf32, #tpu.memory_space<vmem>>, %arg14: memref<1x1x32xf32, #tpu.memory_space<vmem>>, %arg15: memref<1x16x32xf32, #tpu.memory_space<vmem>>, %arg16: memref<16x32xf32, #tpu.memory_space<vmem>>, %arg17: memref<16x16xf32, #tpu.memory_space<vmem>>) attributes {dimension_semantics = [#tpu.dimension_semantics<arbitrary>], iteration_bounds = array<i64: 2>, scalar_prefetch = 0 : i64, scratch_operands = 2 : i64, tpu.core_type = #tpu.core_type<tc>, window_params = [{pipeline_mode = #tpu.pipeline_mode<synchronous>, transform_indices = @transform_0, window_bounds = array<i64: 1, 16>}, {pipeline_mode = #tpu.pipeline_mode<synchronous>, transform_indices = @transform_1, window_bounds = array<i64: 16, 32>}, {transform_indices = @transform_2, window_bounds = array<i64: 1, 32, 96>}, {transform_indices = @transform_3, window_bounds = array<i64: 1, 1, 96>}, {transform_indices = @transform_4, window_bounds = array<i64: 1, 32, 32>}, {transform_indices = @transform_5, window_bounds = array<i64: 1, 1, 32>}, {transform_indices = @transform_6, window_bounds = array<i64: 1, 1, 32>}, {transform_indices = @transform_7, window_bounds = array<i64: 1, 1, 32>}, {transform_indices = @transform_8, window_bounds = array<i64: 1, 32, 64>}, {transform_indices = @transform_9, window_bounds = array<i64: 1, 1, 64>}, {transform_indices = @transform_10, window_bounds = array<i64: 1, 64, 32>}, {transform_indices = @transform_11, window_bounds = array<i64: 1, 1, 32>}, {transform_indices = @transform_12, window_bounds = array<i64: 1, 1, 32>}, {transform_indices = @transform_13, window_bounds = array<i64: 1, 1, 32>}, {transform_indices = @transform_14, window_bounds = array<i64: 1, 16, 32>}]} {
    %c0_i32 = arith.constant 0 : i32
    %0 = arith.cmpi eq, %arg0, %c0_i32 : i32
    %1 = arith.extui %0 : i1 to i32
    %c0_i32_0 = arith.constant 0 : i32
    %2 = arith.cmpi ne, %1, %c0_i32_0 : i32
    scf.if %2 {
      %c0_79 = arith.constant 0 : index
      %c0_80 = arith.constant 0 : index
      %175 = vector.load %arg2[%c0_79, %c0_80] : memref<16x32xf32, #tpu.memory_space<vmem>>, vector<16x32xf32>
      %c0_81 = arith.constant 0 : index
      %c0_82 = arith.constant 0 : index
      %176 = vector.load %arg16[%c0_81, %c0_82] : memref<16x32xf32, #tpu.memory_space<vmem>>, vector<16x32xf32>
      tpu.vector_store %arg16[%c0_81, %c0_82], %175 {strides = array<i32>} : memref<16x32xf32, #tpu.memory_space<vmem>>, vector<16x32xf32>,
      %177 = tpu.iota {dimensions = array<i32: 0>} : vector<16x16xi32>
      %c1_i32 = arith.constant 1 : i32
      %178 = vector.broadcast %c1_i32 : i32 to vector<16x16xi32>
      %179 = arith.andi %177, %178 : vector<16x16xi32>
      %180 = tpu.iota {dimensions = array<i32: 1>} : vector<16x16xi32>
      %c1_i32_83 = arith.constant 1 : i32
      %181 = vector.broadcast %c1_i32_83 : i32 to vector<16x16xi32>
      %182 = arith.andi %180, %181 : vector<16x16xi32>
      %183 = arith.cmpi ne, %179, %182 : vector<16x16xi32>
      %cst_84 = arith.constant -1.000000e+30 : f32
      %cst_85 = arith.constant 0.000000e+00 : f32
      %184 = vector.broadcast %cst_84 : f32 to vector<16x16xf32>
      %185 = vector.broadcast %cst_85 : f32 to vector<16x16xf32>
      %186 = arith.select %183, %184, %185 : vector<16x16xi1>, vector<16x16xf32>
      %c0_86 = arith.constant 0 : index
      %c0_87 = arith.constant 0 : index
      %187 = vector.load %arg1[%c0_86, %c0_87] : memref<1x16xf32, #tpu.memory_space<vmem>>, vector<1x16xf32>
      %188 = vector.broadcast %187 : vector<1x16xf32> to vector<16x16xf32>
      %189 = arith.addf %186, %188 : vector<16x16xf32>
      %c0_88 = arith.constant 0 : index
      %c0_89 = arith.constant 0 : index
      %190 = vector.load %arg17[%c0_88, %c0_89] : memref<16x16xf32, #tpu.memory_space<vmem>>, vector<16x16xf32>
      tpu.vector_store %arg17[%c0_88, %c0_89], %189 {strides = array<i32>} : memref<16x16xf32, #tpu.memory_space<vmem>>, vector<16x16xf32>,
    } else {
    }
    %c0 = arith.constant 0 : index
    %c0_1 = arith.constant 0 : index
    %3 = vector.load %arg16[%c0, %c0_1] : memref<16x32xf32, #tpu.memory_space<vmem>>, vector<16x32xf32>
    %c0_2 = arith.constant 0 : index
    %c0_3 = arith.constant 0 : index
    %4 = vector.load %arg17[%c0_2, %c0_3] : memref<16x16xf32, #tpu.memory_space<vmem>>, vector<16x16xf32>
    %c0_4 = arith.constant 0 : index
    %c0_5 = arith.constant 0 : index
    %c0_6 = arith.constant 0 : index
    %5 = vector.load %arg3[%c0_4, %c0_5, %c0_6] : memref<1x32x96xf32, #tpu.memory_space<vmem>>, vector<1x32x96xf32>
    %6 = vector.shape_cast %5 : vector<1x32x96xf32> to vector<32x96xf32>
    %cst = arith.constant dense<0.000000e+00> : vector<16x96xf32>
    %7 = tpu.matmul %3, %6, %cst {dimension_numbers = #tpu.dot_dimension_numbers<[1], [0], [0], [1], [0, 0, 1, 1], [], []>} : vector<16x32xf32>, vector<32x96xf32>, vector<16x96xf32> -> vector<16x96xf32>
    %c0_7 = arith.constant 0 : index
    %c0_8 = arith.constant 0 : index
    %c0_9 = arith.constant 0 : index
    %8 = vector.load %arg4[%c0_7, %c0_8, %c0_9] : memref<1x1x96xf32, #tpu.memory_space<vmem>>, vector<1x1x96xf32>
    %9 = vector.shape_cast %8 : vector<1x1x96xf32> to vector<1x96xf32>
    %10 = vector.broadcast %9 : vector<1x96xf32> to vector<16x96xf32>
    %11 = arith.addf %7, %10 : vector<16x96xf32>
    %12 = vector.extract_strided_slice %11 {offsets = [0, 0], sizes = [16, 32], strides = [1, 1]} : vector<16x96xf32> to vector<16x32xf32>
    %13 = vector.extract_strided_slice %11 {offsets = [0, 32], sizes = [16, 32], strides = [1, 1]} : vector<16x96xf32> to vector<16x32xf32>
    %14 = vector.extract_strided_slice %11 {offsets = [0, 64], sizes = [16, 32], strides = [1, 1]} : vector<16x96xf32> to vector<16x32xf32>
    %15 = vector.extract_strided_slice %12 {offsets = [0, 0], sizes = [16, 8], strides = [1, 1]} : vector<16x32xf32> to vector<16x8xf32>
    %16 = vector.extract_strided_slice %12 {offsets = [0, 8], sizes = [16, 8], strides = [1, 1]} : vector<16x32xf32> to vector<16x8xf32>
    %17 = vector.extract_strided_slice %12 {offsets = [0, 16], sizes = [16, 8], strides = [1, 1]} : vector<16x32xf32> to vector<16x8xf32>
    %18 = vector.extract_strided_slice %12 {offsets = [0, 24], sizes = [16, 8], strides = [1, 1]} : vector<16x32xf32> to vector<16x8xf32>
    %19 = vector.shape_cast %15 : vector<16x8xf32> to vector<1x16x8xf32>
    %20 = vector.shape_cast %16 : vector<16x8xf32> to vector<1x16x8xf32>
    %21 = vector.shape_cast %17 : vector<16x8xf32> to vector<1x16x8xf32>
    %22 = vector.shape_cast %18 : vector<16x8xf32> to vector<1x16x8xf32>
    %23 = tpu.concatenate %19, %20, %21, %22 in 0 : vector<1x16x8xf32>, vector<1x16x8xf32>, vector<1x16x8xf32>, vector<1x16x8xf32> -> vector<4x16x8xf32>
    %24 = vector.extract_strided_slice %13 {offsets = [0, 0], sizes = [16, 8], strides = [1, 1]} : vector<16x32xf32> to vector<16x8xf32>
    %25 = vector.extract_strided_slice %13 {offsets = [0, 8], sizes = [16, 8], strides = [1, 1]} : vector<16x32xf32> to vector<16x8xf32>
    %26 = vector.extract_strided_slice %13 {offsets = [0, 16], sizes = [16, 8], strides = [1, 1]} : vector<16x32xf32> to vector<16x8xf32>
    %27 = vector.extract_strided_slice %13 {offsets = [0, 24], sizes = [16, 8], strides = [1, 1]} : vector<16x32xf32> to vector<16x8xf32>
    %28 = vector.shape_cast %24 : vector<16x8xf32> to vector<1x16x8xf32>
    %29 = vector.shape_cast %25 : vector<16x8xf32> to vector<1x16x8xf32>
    %30 = vector.shape_cast %26 : vector<16x8xf32> to vector<1x16x8xf32>
    %31 = vector.shape_cast %27 : vector<16x8xf32> to vector<1x16x8xf32>
    %32 = tpu.concatenate %28, %29, %30, %31 in 0 : vector<1x16x8xf32>, vector<1x16x8xf32>, vector<1x16x8xf32>, vector<1x16x8xf32> -> vector<4x16x8xf32>
    %33 = vector.extract_strided_slice %14 {offsets = [0, 0], sizes = [16, 8], strides = [1, 1]} : vector<16x32xf32> to vector<16x8xf32>
    %34 = vector.extract_strided_slice %14 {offsets = [0, 8], sizes = [16, 8], strides = [1, 1]} : vector<16x32xf32> to vector<16x8xf32>
    %35 = vector.extract_strided_slice %14 {offsets = [0, 16], sizes = [16, 8], strides = [1, 1]} : vector<16x32xf32> to vector<16x8xf32>
    %36 = vector.extract_strided_slice %14 {offsets = [0, 24], sizes = [16, 8], strides = [1, 1]} : vector<16x32xf32> to vector<16x8xf32>
    %37 = vector.shape_cast %33 : vector<16x8xf32> to vector<1x16x8xf32>
    %38 = vector.shape_cast %34 : vector<16x8xf32> to vector<1x16x8xf32>
    %39 = vector.shape_cast %35 : vector<16x8xf32> to vector<1x16x8xf32>
    %40 = vector.shape_cast %36 : vector<16x8xf32> to vector<1x16x8xf32>
    %41 = tpu.concatenate %37, %38, %39, %40 in 0 : vector<1x16x8xf32>, vector<1x16x8xf32>, vector<1x16x8xf32>, vector<1x16x8xf32> -> vector<4x16x8xf32>
    %cst_10 = arith.constant dense<0.000000e+00> : vector<4x16x16xf32>
    %42 = tpu.matmul %23, %32, %cst_10 {dimension_numbers = #tpu.dot_dimension_numbers<[2], [2], [1], [1], [0, 0, 0, 1, 1, 1], [0], [0]>} : vector<4x16x8xf32>, vector<4x16x8xf32>, vector<4x16x16xf32> -> vector<4x16x16xf32>
    %43 = vector.shape_cast %4 : vector<16x16xf32> to vector<1x16x16xf32>
    %44 = vector.broadcast %43 : vector<1x16x16xf32> to vector<4x16x16xf32>
    %45 = arith.addf %42, %44 : vector<4x16x16xf32>
    %cst_11 = arith.constant dense<0xFF800000> : vector<4x16xf32>
    %46 = vector.multi_reduction <maximumf>, %45, %cst_11 [2] : vector<4x16x16xf32> to vector<4x16xf32>
    %47 = vector.shape_cast %46 : vector<4x16xf32> to vector<4x16x1xf32>
    %48 = vector.broadcast %47 : vector<4x16x1xf32> to vector<4x16x16xf32>
    %49 = arith.subf %45, %48 : vector<4x16x16xf32>
    %50 = math.exp %49 : vector<4x16x16xf32>
    %cst_12 = arith.constant dense<0.000000e+00> : vector<4x16xf32>
    %51 = vector.multi_reduction <add>, %50, %cst_12 [2] : vector<4x16x16xf32> to vector<4x16xf32>
    %52 = vector.shape_cast %51 : vector<4x16xf32> to vector<4x16x1xf32>
    %53 = tpu.reciprocal %52 {approx = true} : vector<4x16x1xf32> -> vector<4x16x1xf32>
    %54 = vector.broadcast %53 : vector<4x16x1xf32> to vector<4x16x16xf32>
    %55 = arith.mulf %50, %54 : vector<4x16x16xf32>
    %cst_13 = arith.constant dense<0.000000e+00> : vector<4x16x8xf32>
    %56 = tpu.matmul %55, %41, %cst_13 {dimension_numbers = #tpu.dot_dimension_numbers<[2], [1], [1], [2], [0, 0, 0, 1, 1, 2], [0], [0]>} : vector<4x16x16xf32>, vector<4x16x8xf32>, vector<4x16x8xf32> -> vector<4x16x8xf32>
    %c0_14 = arith.constant 0 : index
    %c0_15 = arith.constant 0 : index
    %c0_16 = arith.constant 0 : index
    %57 = vector.load %arg5[%c0_14, %c0_15, %c0_16] : memref<1x32x32xf32, #tpu.memory_space<vmem>>, vector<1x32x32xf32>
    %58 = vector.shape_cast %57 : vector<1x32x32xf32> to vector<32x32xf32>
    %59 = vector.shape_cast %58 : vector<32x32xf32> to vector<4x8x32xf32>
    %cst_17 = arith.constant dense<0.000000e+00> : vector<4x16x32xf32>
    %60 = tpu.matmul %56, %59, %cst_17 {dimension_numbers = #tpu.dot_dimension_numbers<[2], [1], [1], [2], [0, 0, 0, 1, 1, 2], [0], [0]>} : vector<4x16x8xf32>, vector<4x8x32xf32>, vector<4x16x32xf32> -> vector<4x16x32xf32>
    %cst_18 = arith.constant dense<0.000000e+00> : vector<16x32xf32>
    %61 = vector.multi_reduction <add>, %60, %cst_18 [0] : vector<4x16x32xf32> to vector<16x32xf32>
    %c0_19 = arith.constant 0 : index
    %c0_20 = arith.constant 0 : index
    %c0_21 = arith.constant 0 : index
    %62 = vector.load %arg6[%c0_19, %c0_20, %c0_21] : memref<1x1x32xf32, #tpu.memory_space<vmem>>, vector<1x1x32xf32>
    %63 = vector.shape_cast %62 : vector<1x1x32xf32> to vector<1x32xf32>
    %64 = vector.broadcast %63 : vector<1x32xf32> to vector<16x32xf32>
    %65 = arith.addf %61, %64 : vector<16x32xf32>
    %66 = arith.addf %3, %65 : vector<16x32xf32>
    %c0_22 = arith.constant 0 : index
    %c0_23 = arith.constant 0 : index
    %c0_24 = arith.constant 0 : index
    %67 = vector.load %arg7[%c0_22, %c0_23, %c0_24] : memref<1x1x32xf32, #tpu.memory_space<vmem>>, vector<1x1x32xf32>
    %68 = vector.shape_cast %67 : vector<1x1x32xf32> to vector<1x32xf32>
    %c0_25 = arith.constant 0 : index
    %c0_26 = arith.constant 0 : index
    %c0_27 = arith.constant 0 : index
    %69 = vector.load %arg8[%c0_25, %c0_26, %c0_27] : memref<1x1x32xf32, #tpu.memory_space<vmem>>, vector<1x1x32xf32>
    %70 = vector.shape_cast %69 : vector<1x1x32xf32> to vector<1x32xf32>
    %cst_28 = arith.constant dense<0.000000e+00> : vector<16xf32>
    %71 = vector.multi_reduction <add>, %66, %cst_28 [1] : vector<16x32xf32> to vector<16xf32>
    %72 = vector.shape_cast %71 : vector<16xf32> to vector<16x1xf32>
    %cst_29 = arith.constant 3.200000e+01 : f32
    %73 = vector.broadcast %cst_29 : f32 to vector<16x1xf32>
    %74 = arith.divf %72, %73 : vector<16x1xf32>
    %75 = vector.broadcast %74 : vector<16x1xf32> to vector<16x32xf32>
    %76 = arith.subf %66, %75 : vector<16x32xf32>
    %77 = arith.mulf %76, %76 : vector<16x32xf32>
    %cst_30 = arith.constant dense<0.000000e+00> : vector<16xf32>
    %78 = vector.multi_reduction <add>, %77, %cst_30 [1] : vector<16x32xf32> to vector<16xf32>
    %79 = vector.shape_cast %78 : vector<16xf32> to vector<16x1xf32>
    %cst_31 = arith.constant 3.200000e+01 : f32
    %80 = vector.broadcast %cst_31 : f32 to vector<16x1xf32>
    %81 = arith.divf %79, %80 : vector<16x1xf32>
    %cst_32 = arith.constant 9.99999974E-6 : f32
    %82 = vector.broadcast %cst_32 : f32 to vector<16x1xf32>
    %83 = arith.addf %81, %82 : vector<16x1xf32>
    %84 = math.rsqrt %83 : vector<16x1xf32>
    %85 = vector.broadcast %84 : vector<16x1xf32> to vector<16x32xf32>
    %86 = arith.mulf %76, %85 : vector<16x32xf32>
    %87 = vector.broadcast %68 : vector<1x32xf32> to vector<16x32xf32>
    %88 = arith.mulf %86, %87 : vector<16x32xf32>
    %89 = vector.broadcast %70 : vector<1x32xf32> to vector<16x32xf32>
    %90 = arith.addf %88, %89 : vector<16x32xf32>
    %c0_33 = arith.constant 0 : index
    %c0_34 = arith.constant 0 : index
    %c0_35 = arith.constant 0 : index
    %91 = vector.load %arg9[%c0_33, %c0_34, %c0_35] : memref<1x32x64xf32, #tpu.memory_space<vmem>>, vector<1x32x64xf32>
    %92 = vector.shape_cast %91 : vector<1x32x64xf32> to vector<32x64xf32>
    %cst_36 = arith.constant dense<0.000000e+00> : vector<16x64xf32>
    %93 = tpu.matmul %90, %92, %cst_36 {dimension_numbers = #tpu.dot_dimension_numbers<[1], [0], [0], [1], [0, 0, 1, 1], [], []>} : vector<16x32xf32>, vector<32x64xf32>, vector<16x64xf32> -> vector<16x64xf32>
    %c0_37 = arith.constant 0 : index
    %c0_38 = arith.constant 0 : index
    %c0_39 = arith.constant 0 : index
    %94 = vector.load %arg10[%c0_37, %c0_38, %c0_39] : memref<1x1x64xf32, #tpu.memory_space<vmem>>, vector<1x1x64xf32>
    %95 = vector.shape_cast %94 : vector<1x1x64xf32> to vector<1x64xf32>
    %96 = vector.broadcast %95 : vector<1x64xf32> to vector<16x64xf32>
    %97 = arith.addf %93, %96 : vector<16x64xf32>
    %cst_40 = arith.constant 5.000000e-01 : f32
    %98 = vector.broadcast %cst_40 : f32 to vector<16x64xf32>
    %99 = arith.mulf %97, %98 : vector<16x64xf32>
    %cst_41 = arith.constant 0.707106769 : f32
    %100 = vector.broadcast %cst_41 : f32 to vector<16x64xf32>
    %101 = arith.mulf %97, %100 : vector<16x64xf32>
    %cst_42 = arith.constant 0.000000e+00 : f32
    %102 = vector.broadcast %cst_42 : f32 to vector<16x64xf32>
    %103 = arith.cmpf oge, %101, %102 : vector<16x64xf32>
    %cst_43 = arith.constant 1.000000e+00 : f32
    %cst_44 = arith.constant -1.000000e+00 : f32
    %104 = vector.broadcast %cst_43 : f32 to vector<16x64xf32>
    %105 = vector.broadcast %cst_44 : f32 to vector<16x64xf32>
    %106 = arith.select %103, %104, %105 : vector<16x64xi1>, vector<16x64xf32>
    %107 = math.absf %101 : vector<16x64xf32>
    %cst_45 = arith.constant 0.327591091 : f32
    %108 = vector.broadcast %cst_45 : f32 to vector<16x64xf32>
    %109 = arith.mulf %108, %107 : vector<16x64xf32>
    %cst_46 = arith.constant 1.000000e+00 : f32
    %110 = vector.broadcast %cst_46 : f32 to vector<16x64xf32>
    %111 = arith.addf %110, %109 : vector<16x64xf32>
    %cst_47 = arith.constant 1.000000e+00 : f32
    %112 = vector.broadcast %cst_47 : f32 to vector<16x64xf32>
    %113 = arith.divf %112, %111 : vector<16x64xf32>
    %cst_48 = arith.constant 1.06140542 : f32
    %114 = vector.broadcast %cst_48 : f32 to vector<16x64xf32>
    %115 = arith.mulf %114, %113 : vector<16x64xf32>
    %cst_49 = arith.constant -1.45315206 : f32
    %116 = vector.broadcast %cst_49 : f32 to vector<16x64xf32>
    %117 = arith.addf %115, %116 : vector<16x64xf32>
    %118 = arith.mulf %117, %113 : vector<16x64xf32>
    %cst_50 = arith.constant 1.42141378 : f32
    %119 = vector.broadcast %cst_50 : f32 to vector<16x64xf32>
    %120 = arith.addf %118, %119 : vector<16x64xf32>
    %121 = arith.mulf %120, %113 : vector<16x64xf32>
    %cst_51 = arith.constant -0.284496725 : f32
    %122 = vector.broadcast %cst_51 : f32 to vector<16x64xf32>
    %123 = arith.addf %121, %122 : vector<16x64xf32>
    %124 = arith.mulf %123, %113 : vector<16x64xf32>
    %cst_52 = arith.constant 0.254829586 : f32
    %125 = vector.broadcast %cst_52 : f32 to vector<16x64xf32>
    %126 = arith.addf %124, %125 : vector<16x64xf32>
    %127 = arith.mulf %126, %113 : vector<16x64xf32>
    %cst_53 = arith.constant 0.000000e+00 : f32
    %128 = vector.broadcast %cst_53 : f32 to vector<16x64xf32>
    %129 = arith.subf %128, %107 : vector<16x64xf32>
    %130 = arith.mulf %129, %107 : vector<16x64xf32>
    %131 = math.exp %130 : vector<16x64xf32>
    %132 = arith.mulf %127, %131 : vector<16x64xf32>
    %cst_54 = arith.constant 1.000000e+00 : f32
    %133 = vector.broadcast %cst_54 : f32 to vector<16x64xf32>
    %134 = arith.subf %133, %132 : vector<16x64xf32>
    %135 = arith.mulf %106, %134 : vector<16x64xf32>
    %cst_55 = arith.constant 1.000000e+00 : f32
    %136 = vector.broadcast %cst_55 : f32 to vector<16x64xf32>
    %137 = arith.addf %136, %135 : vector<16x64xf32>
    %138 = arith.mulf %99, %137 : vector<16x64xf32>
    %c0_56 = arith.constant 0 : index
    %c0_57 = arith.constant 0 : index
    %c0_58 = arith.constant 0 : index
    %139 = vector.load %arg11[%c0_56, %c0_57, %c0_58] : memref<1x64x32xf32, #tpu.memory_space<vmem>>, vector<1x64x32xf32>
    %140 = vector.shape_cast %139 : vector<1x64x32xf32> to vector<64x32xf32>
    %cst_59 = arith.constant dense<0.000000e+00> : vector<16x32xf32>
    %141 = tpu.matmul %138, %140, %cst_59 {dimension_numbers = #tpu.dot_dimension_numbers<[1], [0], [0], [1], [0, 0, 1, 1], [], []>} : vector<16x64xf32>, vector<64x32xf32>, vector<16x32xf32> -> vector<16x32xf32>
    %142 = arith.addf %90, %141 : vector<16x32xf32>
    %c0_60 = arith.constant 0 : index
    %c0_61 = arith.constant 0 : index
    %c0_62 = arith.constant 0 : index
    %143 = vector.load %arg12[%c0_60, %c0_61, %c0_62] : memref<1x1x32xf32, #tpu.memory_space<vmem>>, vector<1x1x32xf32>
    %144 = vector.shape_cast %143 : vector<1x1x32xf32> to vector<1x32xf32>
    %145 = vector.broadcast %144 : vector<1x32xf32> to vector<16x32xf32>
    %146 = arith.addf %142, %145 : vector<16x32xf32>
    %c0_63 = arith.constant 0 : index
    %c0_64 = arith.constant 0 : index
    %c0_65 = arith.constant 0 : index
    %147 = vector.load %arg13[%c0_63, %c0_64, %c0_65] : memref<1x1x32xf32, #tpu.memory_space<vmem>>, vector<1x1x32xf32>
    %148 = vector.shape_cast %147 : vector<1x1x32xf32> to vector<1x32xf32>
    %c0_66 = arith.constant 0 : index
    %c0_67 = arith.constant 0 : index
    %c0_68 = arith.constant 0 : index
    %149 = vector.load %arg14[%c0_66, %c0_67, %c0_68] : memref<1x1x32xf32, #tpu.memory_space<vmem>>, vector<1x1x32xf32>
    %150 = vector.shape_cast %149 : vector<1x1x32xf32> to vector<1x32xf32>
    %cst_69 = arith.constant dense<0.000000e+00> : vector<16xf32>
    %151 = vector.multi_reduction <add>, %146, %cst_69 [1] : vector<16x32xf32> to vector<16xf32>
    %152 = vector.shape_cast %151 : vector<16xf32> to vector<16x1xf32>
    %cst_70 = arith.constant 3.200000e+01 : f32
    %153 = vector.broadcast %cst_70 : f32 to vector<16x1xf32>
    %154 = arith.divf %152, %153 : vector<16x1xf32>
    %155 = vector.broadcast %154 : vector<16x1xf32> to vector<16x32xf32>
    %156 = arith.subf %146, %155 : vector<16x32xf32>
    %157 = arith.mulf %156, %156 : vector<16x32xf32>
    %cst_71 = arith.constant dense<0.000000e+00> : vector<16xf32>
    %158 = vector.multi_reduction <add>, %157, %cst_71 [1] : vector<16x32xf32> to vector<16xf32>
    %159 = vector.shape_cast %158 : vector<16xf32> to vector<16x1xf32>
    %cst_72 = arith.constant 3.200000e+01 : f32
    %160 = vector.broadcast %cst_72 : f32 to vector<16x1xf32>
    %161 = arith.divf %159, %160 : vector<16x1xf32>
    %cst_73 = arith.constant 9.99999974E-6 : f32
    %162 = vector.broadcast %cst_73 : f32 to vector<16x1xf32>
    %163 = arith.addf %161, %162 : vector<16x1xf32>
    %164 = math.rsqrt %163 : vector<16x1xf32>
    %165 = vector.broadcast %164 : vector<16x1xf32> to vector<16x32xf32>
    %166 = arith.mulf %156, %165 : vector<16x32xf32>
    %167 = vector.broadcast %148 : vector<1x32xf32> to vector<16x32xf32>
    %168 = arith.mulf %166, %167 : vector<16x32xf32>
    %169 = vector.broadcast %150 : vector<1x32xf32> to vector<16x32xf32>
    %170 = arith.addf %168, %169 : vector<16x32xf32>
    %c0_74 = arith.constant 0 : index
    %c0_75 = arith.constant 0 : index
    %171 = vector.load %arg16[%c0_74, %c0_75] : memref<16x32xf32, #tpu.memory_space<vmem>>, vector<16x32xf32>
    tpu.vector_store %arg16[%c0_74, %c0_75], %170 {strides = array<i32>} : memref<16x32xf32, #tpu.memory_space<vmem>>, vector<16x32xf32>,
    %c0_76 = arith.constant 0 : index
    %c0_77 = arith.constant 0 : index
    %c0_78 = arith.constant 0 : index
    %172 = vector.load %arg15[%c0_76, %c0_77, %c0_78] : memref<1x16x32xf32, #tpu.memory_space<vmem>>, vector<1x16x32xf32>
    %173 = vector.shape_cast %172 : vector<1x16x32xf32> to vector<16x32xf32>
    %174 = vector.shape_cast %170 : vector<16x32xf32> to vector<1x16x32xf32>
    tpu.vector_store %arg15[%c0_76, %c0_77, %c0_78], %174 {strides = array<i32>} : memref<1x16x32xf32, #tpu.memory_space<vmem>>, vector<1x16x32xf32>,
    return
  }
  func.func @transform_0(%arg0: i32) -> (i32, i32) {
    %c0_i32 = arith.constant 0 : i32
    %c0_i32_0 = arith.constant 0 : i32
    %c0_i32_1 = arith.constant 0 : i32
    return %c0_i32, %c0_i32_0 : i32, i32
  }
  func.func @transform_1(%arg0: i32) -> (i32, i32) {
    %c0_i32 = arith.constant 0 : i32
    %c0_i32_0 = arith.constant 0 : i32
    %c0_i32_1 = arith.constant 0 : i32
    return %c0_i32, %c0_i32_0 : i32, i32
  }
  func.func @transform_2(%arg0: i32) -> (i32, i32, i32) {
    %c0_i32 = arith.constant 0 : i32
    %c0_i32_0 = arith.constant 0 : i32
    %c0_i32_1 = arith.constant 0 : i32
    return %arg0, %c0_i32, %c0_i32_0 : i32, i32, i32
  }
  func.func @transform_3(%arg0: i32) -> (i32, i32, i32) {
    %c0_i32 = arith.constant 0 : i32
    %c0_i32_0 = arith.constant 0 : i32
    %c0_i32_1 = arith.constant 0 : i32
    return %arg0, %c0_i32, %c0_i32_0 : i32, i32, i32
  }
  func.func @transform_4(%arg0: i32) -> (i32, i32, i32) {
    %c0_i32 = arith.constant 0 : i32
    %c0_i32_0 = arith.constant 0 : i32
    %c0_i32_1 = arith.constant 0 : i32
    return %arg0, %c0_i32, %c0_i32_0 : i32, i32, i32
  }
  func.func @transform_5(%arg0: i32) -> (i32, i32, i32) {
    %c0_i32 = arith.constant 0 : i32
    %c0_i32_0 = arith.constant 0 : i32
    %c0_i32_1 = arith.constant 0 : i32
    return %arg0, %c0_i32, %c0_i32_0 : i32, i32, i32
  }
  func.func @transform_6(%arg0: i32) -> (i32, i32, i32) {
    %c0_i32 = arith.constant 0 : i32
    %c0_i32_0 = arith.constant 0 : i32
    %c0_i32_1 = arith.constant 0 : i32
    return %arg0, %c0_i32, %c0_i32_0 : i32, i32, i32
  }
  func.func @transform_7(%arg0: i32) -> (i32, i32, i32) {
    %c0_i32 = arith.constant 0 : i32
    %c0_i32_0 = arith.constant 0 : i32
    %c0_i32_1 = arith.constant 0 : i32
    return %arg0, %c0_i32, %c0_i32_0 : i32, i32, i32
  }
  func.func @transform_8(%arg0: i32) -> (i32, i32, i32) {
    %c0_i32 = arith.constant 0 : i32
    %c0_i32_0 = arith.constant 0 : i32
    %c0_i32_1 = arith.constant 0 : i32
    return %arg0, %c0_i32, %c0_i32_0 : i32, i32, i32
  }
  func.func @transform_9(%arg0: i32) -> (i32, i32, i32) {
    %c0_i32 = arith.constant 0 : i32
    %c0_i32_0 = arith.constant 0 : i32
    %c0_i32_1 = arith.constant 0 : i32
    return %arg0, %c0_i32, %c0_i32_0 : i32, i32, i32
  }
  func.func @transform_10(%arg0: i32) -> (i32, i32, i32) {
    %c0_i32 = arith.constant 0 : i32
    %c0_i32_0 = arith.constant 0 : i32
    %c0_i32_1 = arith.constant 0 : i32
    return %arg0, %c0_i32, %c0_i32_0 : i32, i32, i32
  }
  func.func @transform_11(%arg0: i32) -> (i32, i32, i32) {
    %c0_i32 = arith.constant 0 : i32
    %c0_i32_0 = arith.constant 0 : i32
    %c0_i32_1 = arith.constant 0 : i32
    return %arg0, %c0_i32, %c0_i32_0 : i32, i32, i32
  }
  func.func @transform_12(%arg0: i32) -> (i32, i32, i32) {
    %c0_i32 = arith.constant 0 : i32
    %c0_i32_0 = arith.constant 0 : i32
    %c0_i32_1 = arith.constant 0 : i32
    return %arg0, %c0_i32, %c0_i32_0 : i32, i32, i32
  }
  func.func @transform_13(%arg0: i32) -> (i32, i32, i32) {
    %c0_i32 = arith.constant 0 : i32
    %c0_i32_0 = arith.constant 0 : i32
    %c0_i32_1 = arith.constant 0 : i32
    return %arg0, %c0_i32, %c0_i32_0 : i32, i32, i32
  }
  func.func @transform_14(%arg0: i32) -> (i32, i32, i32) {
    %c0_i32 = arith.constant 0 : i32
    %c0_i32_0 = arith.constant 0 : i32
    %c0_i32_1 = arith.constant 0 : i32
    return %arg0, %c0_i32, %c0_i32_0 : i32, i32, i32
  }
}

</mosaic_0001>

<bundles_post_ra>
// kernel: tpu_custom_call.1
= control target key start
LH: loop header
LB: loop body
LE: loop exit
PB: predicated region body
PF: predicated region fallthrough
CT: control target
= control target key end

     0   :  { %s3635_s0 = inlined_call_operand.hbm [shape: f32[1,16], index: 0, kind: input, shape index: {}]   ;;  %s3636_s1 = inlined_call_operand.hbm [shape: f32[16,32], index: 1, kind: input, shape index: {}]   ;;  %s3637_s2 = inlined_call_operand.vmem [shape: f32[2,32,96], index: 2, kind: input, shape index: {}]   ;;  %s3638_s3 = inlined_call_operand.vmem [shape: f32[2,1,96], index: 3, kind: input, shape index: {}]   ;;  %s3639_s4 = inlined_call_operand.vmem [shape: f32[2,32,32], index: 4, kind: input, shape index: {}]   ;;  %s3640_s5 = inlined_call_operand.vmem [shape: f32[2,1,32], index: 5, kind: input, shape index: {}]   ;;  %s3641_s6 = inlined_call_operand.vmem [shape: f32[2,1,32], index: 6, kind: input, shape index: {}]   ;;  %s3642_s7 = inlined_call_operand.vmem [shape: f32[2,1,32], index: 7, kind: input, shape index: {}]   ;;  %s3643_s8 = inlined_call_operand.vmem [shape: f32[2,32,64], index: 8, kind: input, shape index: {}]   ;;  %s3644_s9 = inlined_call_operand.vmem [shape: f32[2,1,64], index: 9, kind: input, shape index: {}]   ;;  %s3645_s10 = inlined_call_operand.vmem [shape: f32[2,64,32], index: 10, kind: input, shape index: {}]   ;;  %s3646_s11 = inlined_call_operand.vmem [shape: f32[2,1,32], index: 11, kind: input, shape index: {}]   ;;  %s3647_s12 = inlined_call_operand.vmem [shape: f32[2,1,32], index: 12, kind: input, shape index: {}]   ;;  %s3648_s13 = inlined_call_operand.vmem [shape: f32[2,1,32], index: 13, kind: input, shape index: {}]   ;;  %s3649_s14 = inlined_call_operand.hbm [shape: f32[2,16,32], index: 14, kind: output, shape index: {}]  }
   0x1   :  { %3665 = sst [smem:[#allocation22_spill]] %s3635_s0 }
   0x2   :  { %3666 = sst [smem:[#allocation23_spill]] %s3636_s1 }
   0x3   :  { %3667 = sst [smem:[#allocation24_spill]] %s3637_s2 }
   0x4   :  { %3668 = sst [smem:[#allocation25_spill]] %s3639_s4 }
   0x5   :  { %3669 = sst [smem:[#allocation26_spill]] %s3649_s14 }
   0x6   :  { %19 = vsyncpa [#allocation5], 0 }
   0x7   :  { %20 = vsyncpa [#allocation8], 0 }
   0x8   :  { %21 = vsyncpa [#allocation6], 0 }
   0x9   :  { %23 = vsyncpa [#allocation6 + $0x1], 0  ;;  %s3201_s29 = smov 0   ;;  %s3203_s30 = smov 0  }
   0xa   :  { %s3205_s15 = smov 0   ;;  %s3207_s16 = smov 0  }
   0xb LB: > { %3670 = sst [smem:[#allocation13_spill]] %s3098_s29  ;;  %s3222_s17 = sadd.s32 4294967295, %s3110_s16   ;;  %s3110_s16 = sphi %s3207_s16, %s3710_s16   ;;  %s3106_s15 = sphi %s3205_s15, %s3713_s15   ;;  %s3102_s30 = sphi %s3203_s30, %s3712_s30   ;;  %s3098_s29 = sphi %s3201_s29, %s3711_s29  }
   0xc   : > { %3671 = sst [smem:[#allocation14_spill]] %s3102_s30  ;;  %s2495_s18 = sadd.s32 4294967294, %s3110_s16  }
   0xd   : > { %3672 = sst [smem:[#allocation15_spill]] %s3106_s15  ;;  %s3226_s19 = sadd.s32 1, %s3110_s16  }
   0xe   : > { %3673 = sst [smem:[#allocation16_spill]] %s3110_s16  ;;  %s390_s20 = sadd.s32 1, %s3106_s15 }
   0xf   : > { %3674 = sst [smem:[#allocation17_spill]] %s3226_s19  ;;  %s387_s21 = ssub.s32 %s3110_s16, %s3226_s19 }
  0x10   : > { %p400_p0 = scmp.ne.s32.totalorder %s3106_s15, %s3102_s30  ;;  %p388_p1 = scmp.eq.s32.totalorder %s387_s21, 0 }
  0x11   : > { %p401_p2 = scmp.eq.s32.totalorder %s3222_s17, 1  ;;  %p406_p3 = scmp.ne.s32.totalorder %s3102_s30, %s3098_s29 }
  0x12   : > { %p407_p4 = scmp.eq.s32.totalorder %s2495_s18, 1  ;;  %p2496_p7 = scmp.ge.s32.totalorder %s3110_s16, 1 }
  0x13   : > { %s3237_s22 = scalar_select %p388_p1, %s3106_s15, %s390_s20  }
  0x14   : > { %p3239_p5 = por %p401_p2, %p400_p0  ;;  %p3243_p6 = por %p407_p4, %p406_p3 }
  0x15   : > { %3675 = sst [smem:[#allocation18_spill]] %s3237_s22  ;;  %p414_p8 = scmp.lt.s32.totalorder %s3110_s16, 3 }
  0x16   : > { %s3676_s23 = scalar_select %p3239_p5, 1, 0 }
  0x17   : > { %s3678_s24 = scalar_select %p3243_p6, 1, 0 }
  0x18   : > { %3677 = sst [smem:[#allocation19_spill]] %s3676_s23  ;;  %p3655_p10 = scmp.eq.s32.totalorder %s3222_s17, 0 }
  0x19   : > { %3679 = sst [smem:[#allocation20_spill]] %s3678_s24  ;;  %p3251_p11 = pnand %p2496_p7, %p414_p8 }
  0x1a   : > { %s3112_s26 = smov [#allocation4]   ;;  %s3113_s28 = smov [#allocation7]  }
  0x1b   : > { %s3680_s25 = scalar_select %p3251_p11, 1, 0 }
  0x1c   : > { %s427_s27 = sshll.u32 %s3112_s26, 4  ;;  %p2835_p12 = pneg %p3251_p11  ;;  %s428_s27 = int_to_ptr.vmem [resolvable:$true] %s427_s27 }
  0x1d   : > { %s437_s18 = sshll.u32 %s3113_s28, 4  ;;  %s3682_s0 = sld [smem:[#allocation22_spill]]  ;;  %s3263_s18 = int_to_ptr.vmem [resolvable:$true] %s437_s18 }
  0x1e   : > { %p3259_p13 = pnand %p3655_p10, %p2835_p12 }
  0x20   : > { %p2986_p1 = pneg %p3259_p13 }
  0x23   : > { %s2984_s15 = scalar_lea.hbm %s3682_s0, 16 }
  0x24   : > { %p2985_p0 = scmp.ne.s32.totalorder %s3682_s0, %s2984_s15  ;;  %p2991_p4 = scmp.lt.u32.totalorder %s2984_s15, %s3682_s0 }
  0x26   : > { %p2987_p2 = pnand %p2986_p1, %p2985_p0 }
  0x28   : > { %p2988_p3 = pneg %p2987_p2 }
  0x2a   : > { %p2993_p7 = pnand %p2991_p4, %p2988_p3 }
  0x2c   : > { %2996 = shalt.err (!%p2993_p7)
}
  0x2d   : > { %s2997_s29 = scalar_lea.vmem %s428_s27, 16  ;;  %s3004_s19 = scalar_lea.vmem %s428_s27, 32 }
  0x2e   : > { %p2998_p8 = scmp.ne.s32.totalorder %s428_s27, %s2997_s29  ;;  %p3005_p10 = scmp.lt.s32.totalorder %s428_s27, %s428_s27 }
  0x2f   : > { %p3006_p6 = scmp.lt.s32.totalorder %s3004_s19, %s2997_s29 }
  0x30   : > { %p3000_p12 = pnand %p2998_p8, %p2986_p1 }
  0x31   : > { %p3007_p5 = por %p3006_p6, %p3005_p10 }
  0x32   : > { %p3001_p9 = pneg %p3000_p12 }
  0x34   : > { %p3008_p11 = pnand %p3007_p5, %p3001_p9 }
  0x36   : > { %3011 = shalt.err (!%p3008_p11)
}
  0x37   : > { %2838 = dma.hbm_to_vmem [thread:$0]  (!%p3259_p13), %s3682_s0, 16, %s428_s27, [#allocation5]  }
  0x38   : > { %s3683_s1 = sld [smem:[#allocation23_spill]] }
  0x3e   : > { %s3012_s26 = scalar_lea.hbm %s3683_s1, 256 }
  0x3f   : > { %p3013_p0 = scmp.ne.s32.totalorder %s3683_s1, %s3012_s26  ;;  %p3019_p9 = scmp.lt.u32.totalorder %s3012_s26, %s3683_s1 }
  0x41   : > { %p3015_p6 = pnand %p3013_p0, %p2986_p1 }
  0x43   : > { %p3016_p5 = pneg %p3015_p6 }
  0x45   : > { %p3021_p10 = pnand %p3019_p9, %p3016_p5 }
  0x47   : > { %3024 = shalt.err (!%p3021_p10)
}
  0x48   : > { %s3025_s27 = scalar_lea.vmem %s3263_s18, 256  ;;  %p3033_p4 = scmp.lt.s32.totalorder %s3263_s18, %s3263_s18 }
  0x49   : > { %p3026_p11 = scmp.ne.s32.totalorder %s3263_s18, %s3025_s27  ;;  %p3034_p7 = scmp.lt.s32.totalorder %s3025_s27, %s3025_s27 }
  0x4b   : > { %p3028_p2 = pnand %p3026_p11, %p2986_p1  ;;  %p3035_p8 = por %p3034_p7, %p3033_p4 }
  0x4d   : > { %p3029_p3 = pneg %p3028_p2 }
  0x4f   : > { %p3036_p12 = pnand %p3035_p8, %p3029_p3 }
  0x51   : > { %3039 = shalt.err (!%p3036_p12)
}
  0x52   : > { %s3114_s16 = smov 128   ;;  %s3115_s22 = smov 8  }
  0x53   : > { %2841 = dma.hbm_to_vmem [thread:$0]  (!%p3259_p13), %s3683_s1, 256, %s3263_s18, [#allocation8], %s3114_s16, %s3114_s16, %s3115_s22  }
  0x54   : > { %p3684_p0 = scmp.ne.s32.totalorder %s3680_s25, 0 }
  0x56   : > { %533 = sbr.rel (%p3684_p0) target bundleno = 2742 (0xab6), region = 76 }
  0x5d   : > { %p3685_p1 = scmp.eq.s32.totalorder %s3222_s17, 0 }
  0x5f   : > { %3085 = dma.done.wait (%p3685_p1), [#allocation5], 16   ;;  %p3686_p6 = pmov %p3685_p1 }
  0x60   : > { %p3687_p5 = pmov %p3685_p1 }
  0x61   : > { %3087 = vsyncadd (%p3686_p6), [#allocation5], 4294967280 }
  0x62   : > { %3089 = dma.done.wait (%p3687_p5), [#allocation8], 256   ;;  %p3688_p9 = pmov %p3685_p1 }
  0x63   : > { %s3659_s18 = sand.u32 1, %s3102_s30   ;;  %p622_p13 = scmp.lt.s32.totalorder %s3222_s17, 1 }
  0x64   : > { %3091 = vsyncadd (%p3688_p9), [#allocation8], 4294967040  ;;  %s2503_s25 = sshll.u32 %s3659_s18, 4  ;;  %s3689_s2 = sld [smem:[#allocation24_spill]] }
  0x65   : > { %s3327_s20 = scalar_select %p622_p13, %s3222_s17, 1 }
  0x66   : > { %s3690_s4 = sld [smem:[#allocation25_spill]]  ;;  %s3383_s22 = scalar_lea.vmem [#allocation9], %s2503_s25 }
  0x67   : > { %s2565_s21 = sshll.u32 %s3327_s20, 5  ;;  %s659_s26 = scalar_lea.vmem %s3646_s11, %s3327_s20 }
  0x68   : > { %s662_s19 = scalar_lea.vmem %s3647_s12, %s3327_s20  ;;  %s665_s30 = scalar_lea.vmem %s3648_s13, %s3327_s20 }
  0x69   : > { %p3692_p10 = scmp.ne.s32.totalorder %s3222_s17, 0 }
  0x6a   : > { %s3337_s16 = scalar_lea.vmem %s3689_s2, %s2565_s21  ;;  %s3359_s2 = scalar_lea.vmem %s3643_s8, %s2565_s21  ;;  %v670_v0 = vld [vmem:[#allocation7] sm:$0xff] (!%p3692_p10)  ;;  %vm672_vm0 = vcmask (!%p3692_p10), 261120   ;;  %v671_v1 = vld [vmem:[#allocation7 + $0x8] sm:$0xff] (!%p3692_p10)  ;;  %v675_v2 = vlaneseq (!%p3692_p10)  ;;  %v2513_v8 = vld [vmem:[#allocation4] ss:$0 sm:$0xff] (!%p3692_p10)  ;;  %v3116_v10 = vmov (!%p3692_p10), 0.0  }
  0x6b   : > { %669 = sbr.rel (%p3692_p10) target bundleno = 119 (0x77), region = 88  ;;  %673 = vst.msk [vmem:[#allocation2] sm:$0xff] (!%p3692_p10), %vm672_vm0, %v670_v0  ;;  %674 = vst.msk [vmem:[#allocation2 + $0x8] sm:$0xff] (!%p3692_p10), %vm672_vm0, %v671_v1  ;;  %vm696_vm2 = vcmask (!%p3692_p10), 130048  }
  0x6c   : > { %s3342_s15 = scalar_lea.vmem %s3690_s4, %s2565_s21  ;;  %s651_s4 = scalar_lea.vmem %s3644_s9, %s3327_s20  ;;  %v676_v3 = vshrl.u32 (!%p3692_p10), %v675_v2, 7  ;;  %v681_v4 = vand.u32 (!%p3692_p10), 127, %v675_v2 }
  0x6d   : > { %3691 = sst [smem:[#allocation21_spill]] %s3342_s15  ;;  %s2568_s15 = sshll.u32 %s3327_s20, 6 }
  0x6e   : > { %s3369_s1 = scalar_lea.vmem %s3645_s10, %s2568_s15  ;;  %v678_v5 = vand.u32 (!%p3692_p10), 1, %v676_v3  ;;  %v682_v6 = vand.u32 (!%p3692_p10), 1, %v681_v4  ;;  %v677_v7 = vadd.s32 (!%p3692_p10), 8, %v676_v3 }
  0x70   : > { %vm683_vm1 = vcmp.ne.s32.totalorder (!%p3692_p10), %v678_v5, %v682_v6  ;;  %v679_v9 = vand.u32 (!%p3692_p10), 1, %v677_v7 }
  0x71   : > { %v685_v11 = vsel (!%p3692_p10), %vm683_vm1, -1e+30, %v3116_v10 }
  0x72   : > { %v694_v12 = vadd.f32 %v2513_v8, %v685_v11  ;;  %vm684_vm3 = vcmp.ne.s32.totalorder %v679_v9, %v682_v6 }
  0x73   : > { %v686_v13 = vsel %vm684_vm3, -1e+30, %v3116_v10 }
  0x74   : > { %697 = vst.msk [vmem:[#allocation3] sm:$0xff] %vm696_vm2, %v694_v12  ;;  %v695_v14 = vadd.f32 %v2513_v8, %v686_v13 }
  0x76   : > { %698 = vst.msk [vmem:[#allocation3 + $0x8] sm:$0xff] %vm696_vm2, %v695_v14 }
  0x77 PF: > { %v703_v15 = vld [vmem:[%s3337_s16] sm:$0xff]  ;;  %v704_v16 = vld [vmem:[%s3337_s16 + $0x8] sm:$0xff]  ;;  %v705_v17 = vld [vmem:[%s3337_s16 + $0x10] sm:$0xff]  ;;  %vm714_vm4 = vcmask 261120   ;;  %s3693_s15 = scalar_lea.vmem %s3638_s3, %s3327_s20  ;;  %vm814_vm5 = vcmask 64512   ;;  %s3118_s24 = smov 120  }
  0x78   : > { %v2753_v18 = vpack.c.bf16 %v704_v16, %v703_v15  ;;  %v706_v19 = vld [vmem:[%s3337_s16 + $0x18] sm:$0xff]  ;;  %v3391_v20 = vld [vmem:[#allocation2] sm:$0xff]  ;;  %v3395_v22 = vld [vmem:[#allocation2 + $0x8] sm:$0xff]  ;;  %s3117_s16 = smov 112   ;;  %s3119_s0 = smov 104   ;;  %vm1159_vm7 = vcmask 130048  }
  0x79   : > { %v2757_v21 = vpack.c.bf16 %v706_v19, %v705_v17  ;;  %2644 = vmatprep.mubr.msk.f32.mxu0 %vm714_vm4, %v3391_v20  ;;  %v2514_v23 = vld [vmem:[%s3693_s15] ss:$0 sm:$0xff]  ;;  %s3120_s18 = smov 96   ;;  %vm3420_vm6 = vmpackc.low %vm814_vm5, %vm814_vm5  ;;  %s3121_s14 = smov 64   ;;  %vm2148_vm10 = vcmask 523264  }
  0x7a   : > { %2754 = vmatprep.subr.bf16.mxu0 %v2753_v18  ;;  %s3696_s23 = sld [smem:[#allocation21_spill]]  ;;  %s3697_s27 = scalar_lea.vmem %s3640_s5, %s3327_s20 }
  0x7b   : > { %2756 = vmatpush3.bf16.msra.mxu0 %v2753_v18  ;;  %v701_v56 = vld [vmem:[#allocation3] sm:$0xff]  ;;  %s3698_s15 = scalar_lea.vmem %s3641_s6, %s3327_s20  ;;  %s2569_s25 = sshll.u32 %s3222_s17, 8 }
  0x7c   : > { %2758 = vmatprep.subr.bf16.mxu0 %v2757_v21  ;;  %s2303_s29 = sshll.u32 %s3383_s22, 4  ;;  %s3584_s29 = int_to_ptr.vmem [resolvable:$true] %s2303_s29 }
  0x7d   : > { %v702_v55 = vld [vmem:[#allocation3 + $0x8] sm:$0xff] }
  0x7f   : > { %2760 = vmatpush3.bf16.msra.mxu0 %v2757_v21 }
  0x82   : > { %2645 = vmatmul.mubr.msk.f32.vlgmr.msra.gmra.mrb[0].mxu0 %vm714_vm4, %v3395_v22 }
 0x155   : > { %v2646_v24 = vpop.f32.mrb[0].mxu0 }
 0x156   : > { %v793_v25 = vadd.f32 %v2646_v24, %v2514_v23  ;;  %v787_v26 = vpop.f32.mrb[1].mxu0 }
 0x157   : > { %v788_v27 = vadd.f32 %v2514_v23, %v787_v26 }
 0x158   : > { %804 = vrot.lane.b32.xlu1 %v793_v25, %s3117_s16 }
 0x159   : > { %798 = vrot.lane.b32.xlu0 %v788_v27, %s3118_s24  ;;  %2651 = vmatprep.mubr.msk.f32.mxu1 %vm814_vm5, %v788_v27  ;;  %v3405_v28 = vpack.i.bf16 %v793_v25, %v788_v27 }
 0x15c   : > { %802 = vrot.lane.b32.xlu1 %v788_v27, %s3117_s16  ;;  %s3702_s16 = sld [smem:[#allocation26_spill]] }
 0x15d   : > { %800 = vrot.lane.b32.xlu0 %v793_v25, %s3118_s24  ;;  %s3699_s24 = scalar_lea.vmem %s3642_s7, %s3327_s20  ;;  %s3040_s20 = scalar_lea.vmem %s3584_s29, 256 }
 0x15e   : > { %p3041_p11 = scmp.ne.s32.totalorder %s3584_s29, %s3040_s20 }
 0x160   : > { %808 = vrot.lane.b32.xlu1 %v793_v25, %s3119_s0 }
 0x161   : > { %806 = vrot.lane.b32.xlu0 %v788_v27, %s3119_s0  ;;  %s3123_s0 = smov [#allocation9]  }
 0x165   : > { %2897 = vrot.lane.b32.xlu0 %v3405_v28, %s3120_s18 }
 0x1ca   : > { %v805_v29 = vpop.permute.xlu1 %804 }
 0x1cb   : > { %v799_v30 = vpop.permute.xlu0 %798 }
 0x1cc   : > { %2658 = vmatprep.mubr.msk.f32.mxu0 %vm814_vm5, %v799_v30 }
 0x1ce   : > { %v803_v31 = vpop.permute.xlu1 %802 }
 0x1cf   : > { %v3409_v32 = vpack.i.bf16 %v805_v29, %v803_v31  ;;  %v801_v33 = vpop.permute.xlu0 %800 }
 0x1d0   : > { %v3411_v34 = vpack.i.bf16 %v801_v33, %v799_v30 }
 0x1d1   : > { %2907 = vrot.lane.b32.xlu0 %v3409_v32, %s3120_s18 }
 0x1d2   : > { %v809_v35 = vpop.permute.xlu1 %808  ;;  %2902 = vrot.lane.b32.xlu1 %v3411_v34, %s3120_s18 }
 0x1d3   : > { %v807_v36 = vpop.permute.xlu0 %806 }
 0x1d4   : > { %v3415_v37 = vpack.i.bf16 %v809_v35, %v807_v36 }
 0x1d6   : > { %2912 = vrot.lane.b32.xlu1 %v3415_v37, %s3120_s18  ;;  %s3044_s18 = sshll.u32 %s3123_s0, 4  ;;  %s3045_s18 = int_to_ptr.vmem [resolvable:$false] %s3044_s18 }
 0x1d7   : > { %v2898_v38 = vpop.permute.xlu0 %2897  ;;  %p3047_p7 = scmp.lt.s32.totalorder %s3584_s29, %s3045_s18 }
 0x1d8   : > { %v2900_v39 = vunpack.i.h.bf16 %v2898_v38  ;;  %v2899_v40 = vunpack.i.l.bf16 %v2898_v38 }
 0x1da   : > { %v2761_v42 = vpack.c.bf16 %v2900_v39, %v2899_v40 }
 0x1dc   : > { %2763 = vmatprep.subr.msk.bf16.mxu1 %vm3420_vm6, %v2761_v42 }
 0x1dd   : > { %2766 = vmatpush3.bf16.xpose.msk.msra.mxu1 %vm3420_vm6, %v2761_v42 }
 0x1e4   : > { %2652 = vmatmul.mubr.msk.f32.vlgmr.msra.gmra.mrb[0].mxu1 %vm814_vm5, %v793_v25 }
 0x1e5   : > { %2665 = vmatprep.mubr.msk.f32.mxu1 %vm814_vm5, %v803_v31 }
 0x243   : > { %v2908_v43 = vpop.permute.xlu0 %2907 }
 0x244   : > { %v2910_v44 = vunpack.i.h.bf16 %v2908_v43  ;;  %v2909_v45 = vunpack.i.l.bf16 %v2908_v43  ;;  %v2903_v46 = vpop.permute.xlu1 %2902 }
 0x245   : > { %v2905_v47 = vunpack.i.h.bf16 %v2903_v46  ;;  %v2904_v48 = vunpack.i.l.bf16 %v2903_v46 }
 0x246   : > { %v2773_v49 = vpack.c.bf16 %v2910_v44, %v2909_v45 }
 0x247   : > { %v2767_v50 = vpack.c.bf16 %v2905_v47, %v2904_v48 }
 0x248   : > { %v2913_v51 = vpop.permute.xlu1 %2912  ;;  %2775 = vmatprep.subr.msk.bf16.mxu1 %vm3420_vm6, %v2773_v49 }
 0x249   : > { %v2915_v52 = vunpack.i.h.bf16 %v2913_v51  ;;  %v2914_v53 = vunpack.i.l.bf16 %v2913_v51  ;;  %2769 = vmatprep.subr.msk.bf16.mxu0 %vm3420_vm6, %v2767_v50  ;;  %2778 = vmatpush3.bf16.xpose.msk.msra.mxu1 %vm3420_vm6, %v2773_v49 }
 0x24a   : > { %2772 = vmatpush3.bf16.xpose.msk.msra.mxu0 %vm3420_vm6, %v2767_v50 }
 0x24b   : > { %v2779_v54 = vpack.c.bf16 %v2915_v52, %v2914_v53 }
 0x24d   : > { %2781 = vmatprep.subr.msk.bf16.mxu0 %vm3420_vm6, %v2779_v54 }
 0x250   : > { %2666 = vmatmul.mubr.msk.f32.vlgmr.msra.gmra.mrb[2].mxu1 %vm814_vm5, %v805_v29 }
 0x251   : > { %2659 = vmatmul.mubr.msk.f32.vlgmr.msra.gmra.mrb[2].mxu0 %vm814_vm5, %v801_v33 }
 0x252   : > { %2784 = vmatpush3.bf16.xpose.msk.msra.mxu0 %vm3420_vm6, %v2779_v54  ;;  %2672 = vmatprep.mubr.msk.f32.mxu0 %vm814_vm5, %v807_v36 }
 0x259   : > { %2673 = vmatmul.mubr.msk.f32.vlgmr.msra.gmra.mrb[4].mxu0 %vm814_vm5, %v809_v35 }
 0x2b7   : > { %v2653_v57 = vpop.f32.mrb[0].mxu1 }
 0x2b8   : > { %v895_v58 = vadd.f32 %v2653_v57, %v702_v55  ;;  %v889_v59 = vpop.f32.mrb[1].mxu1 }
 0x2b9   : > { %v890_v60 = vadd.f32 %v889_v59, %v701_v56 }
 0x2ba   : > { %v1163_v61 = vsel %vm1159_vm7, %v895_v58, -inf }
 0x2bb   : > { %1164 = vmax.xlane.f32.xlu1 %v1163_v61  ;;  %v1160_v62 = vsel %vm1159_vm7, %v890_v60, -inf }
 0x2bc   : > { %1161 = vmax.xlane.f32.xlu0 %v1160_v62 }
 0x323   : > { %v2667_v63 = vpop.f32.mrb[2].mxu1 }
 0x324   : > { %v2660_v0 = vpop.f32.mrb[2].mxu0  ;;  %v1063_v1 = vpop.f32.mrb[3].mxu1  ;;  %v1069_v8 = vadd.f32 %v2667_v63, %v702_v55 }
 0x325   : > { %v982_v2 = vadd.f32 %v2660_v0, %v702_v55  ;;  %v1064_v3 = vadd.f32 %v1063_v1, %v701_v56  ;;  %v976_v4 = vpop.f32.mrb[3].mxu0 }
 0x326   : > { %v977_v5 = vadd.f32 %v976_v4, %v701_v56  ;;  %v1175_v14 = vsel %vm1159_vm7, %v1069_v8, -inf }
 0x327   : > { %v1172_v6 = vsel %vm1159_vm7, %v1064_v3, -inf  ;;  %v1169_v7 = vsel %vm1159_vm7, %v982_v2, -inf }
 0x328   : > { %1173 = vmax.xlane.f32.xlu1 %v1172_v6  ;;  %1170 = vmax.xlane.f32.xlu0 %v1169_v7  ;;  %v1166_v9 = vsel %vm1159_vm7, %v977_v5, -inf }
 0x32c   : > { %v2674_v10 = vpop.f32.mrb[4].mxu0  ;;  %1167 = vmax.xlane.f32.xlu0 %v1166_v9 }
 0x32d   : > { %v1150_v11 = vpop.f32.mrb[5].mxu0  ;;  %v1156_v13 = vadd.f32 %v2674_v10, %v702_v55 }
 0x32e   : > { %v3451_v12 = vadd.f32 %v1150_v11, %v701_v56 }
 0x32f   : > { %v1181_v16 = vsel %vm1159_vm7, %v1156_v13, -inf }
 0x330   : > { %1176 = vmax.xlane.f32.xlu0 %v1175_v14  ;;  %v1178_v15 = vsel %vm1159_vm7, %v3451_v12, -inf }
 0x331   : > { %1179 = vmax.xlane.f32.xlu1 %v1178_v15 }
 0x334   : > { %1182 = vmax.xlane.f32.xlu0 %v1181_v16 }
 0x342   : > { %2917 = vrot.lane.b32.xlu1 %v3405_v28, %s3121_s14 }
 0x348   : > { %v1165_v17 = vpop.xlane.xlu1 %1164 }
 0x349   : > { %v1185_v18 = vsub.f32 %v895_v58, %v1165_v17  ;;  %v1162_v21 = vpop.xlane.xlu0 %1161 }
 0x34a   : > { %v1184_v23 = vsub.f32 %v890_v60, %v1162_v21 }
 0x34b   : > { %v1194_v19 = vmul.f32 1.442695, %v1185_v18  ;;  %v1596_v18 = vld [vmem:[%s3696_s23] sm:$0xff] }
 0x34c   : > { %v1192_v24 = vmul.f32 1.442695, %v1184_v23 }
 0x34d   : > { %2936 = vpow2.f32 %v1194_v19 }
 0x34e   : > { %2938 = vpow2.f32 %v1192_v24 }
 0x357   : > { %v2937_v25 = vpop.eup %2936 }
 0x358   : > { %v1211_v26 = vsel %vm1159_vm7, %v2937_v25, 0.0  ;;  %v2939_v27 = vpop.eup %2938 }
 0x359   : > { %1212 = vadd.xlane.f32.xlu0 %v1211_v26  ;;  %v1208_v29 = vsel %vm1159_vm7, %v2939_v27, 0.0 }
 0x366   : > { %1209 = vadd.xlane.f32.xlu1 %v1208_v29 }
 0x3b5   : > { %v1174_v30 = vpop.xlane.xlu1 %1173  ;;  %v1171_v31 = vpop.xlane.xlu0 %1170 }
 0x3b6   : > { %v1187_v33 = vsub.f32 %v982_v2, %v1171_v31  ;;  %v1188_v28 = vsub.f32 %v1064_v3, %v1174_v30 }
 0x3b8   : > { %v1198_v35 = vmul.f32 1.442695, %v1187_v33  ;;  %v1200_v39 = vmul.f32 1.442695, %v1188_v28 }
 0x3b9   : > { %v1168_v36 = vpop.xlane.xlu0 %1167 }
 0x3ba   : > { %v1186_v38 = vsub.f32 %v977_v5, %v1168_v36  ;;  %2940 = vpow2.f32 %v1198_v35 }
 0x3bc   : > { %v1196_v40 = vmul.f32 1.442695, %v1186_v38 }
 0x3bd   : > { %v1177_v41 = vpop.xlane.xlu0 %1176 }
 0x3be   : > { %2942 = vpow2.f32 %v1196_v40  ;;  %v1189_v42 = vsub.f32 %v1069_v8, %v1177_v41  ;;  %v1180_v43 = vpop.xlane.xlu1 %1179  ;;  %v1598_v41 = vld [vmem:[%s3696_s23 + $0x10] sm:$0xff] }
 0x3bf   : > { %2944 = vpow2.f32 %v1200_v39  ;;  %v1190_v62 = vsub.f32 %v3451_v12, %v1180_v43  ;;  %v1599_v43 = vld [vmem:[%s3696_s23 + $0x18] sm:$0xff] }
 0x3c0   : > { %v1202_v44 = vmul.f32 1.442695, %v1189_v42  ;;  %v1597_v42 = vld [vmem:[%s3696_s23 + $0x8] sm:$0xff]  ;;  %s3700_s23 = sld [smem:[#allocation14_spill]] }
 0x3c1   : > { %v1183_v45 = vpop.xlane.xlu0 %1182  ;;  %v1204_v0 = vmul.f32 1.442695, %v1190_v62 }
 0x3c2   : > { %2946 = vpow2.f32 %v1202_v44  ;;  %v1191_v46 = vsub.f32 %v1156_v13, %v1183_v45  ;;  %v2918_v47 = vpop.permute.xlu1 %2917 }
 0x3c3   : > { %v2920_v48 = vunpack.i.h.bf16 %v2918_v47  ;;  %v2919_v49 = vunpack.i.l.bf16 %v2918_v47 }
 0x3c4   : > { %v1206_v50 = vmul.f32 1.442695, %v1191_v46  ;;  %v3461_v51 = vpop.eup %2940 }
 0x3c5   : > { %v2785_v52 = vpack.c.bf16 %v2920_v48, %v2919_v49  ;;  %v1217_v53 = vsel %vm1159_vm7, %v3461_v51, 0.0 }
 0x3c6   : > { %2948 = vpow2.f32 %v1206_v50  ;;  %1218 = vadd.xlane.f32.xlu0 %v1217_v53 }
 0x3c7   : > { %2786 = vmatprep.subr.bf16.mxu0 %v2785_v52 }
 0x3c8   : > { %v2943_v54 = vpop.eup %2942  ;;  %2788 = vmatpush3.bf16.msra.mxu0 %v2785_v52 }
 0x3c9   : > { %v1214_v55 = vsel %vm1159_vm7, %v2943_v54, 0.0  ;;  %v2945_v56 = vpop.eup %2944 }
 0x3ca   : > { %1215 = vadd.xlane.f32.xlu1 %v1214_v55  ;;  %v1220_v58 = vsel %vm1159_vm7, %v2945_v56, 0.0 }
 0x3cc   : > { %v2947_v57 = vpop.eup %2946 }
 0x3cd   : > { %v1223_v59 = vsel %vm1159_vm7, %v2947_v57, 0.0 }
 0x3ce   : > { %1221 = vadd.xlane.f32.xlu1 %v1220_v58  ;;  %1224 = vadd.xlane.f32.xlu0 %v1223_v59 }
 0x3d0   : > { %v3468_v60 = vpop.eup %2948 }
 0x3d1   : > { %v1229_v61 = vsel %vm1159_vm7, %v3468_v60, 0.0 }
 0x3d2   : > { %1230 = vadd.xlane.f32.xlu0 %v1229_v61 }
 0x3df   : > { %2927 = vrot.lane.b32.xlu1 %v3409_v32, %s3121_s14 }
 0x3e6   : > { %v1213_v63 = vpop.xlane.xlu0 %1212 }
 0x3e7   : > { %2950 = vrcp.f32 %v1213_v63 }
 0x3e8   : > { %2922 = vrot.lane.b32.xlu0 %v3411_v34, %s3121_s14 }
 0x3f1   : > { %v2951_v2 = vpop.eup %2950 }
 0x3f2   : > { %v1241_v6 = vmul.f32 %v2951_v2, %v2937_v25 }
 0x3f3   : > { %v1210_v1 = vpop.xlane.xlu1 %1209 }
 0x3f4   : > { %2952 = vrcp.f32 %v1210_v1 }
 0x3f5   : > { %2954 = vpow2.f32 %v1204_v0 }
 0x3fe   : > { %v2953_v3 = vpop.eup %2952 }
 0x3ff   : > { %v2955_v4 = vpop.eup %2954  ;;  %v1240_v5 = vmul.f32 %v2953_v3, %v2939_v27 }
 0x400   : > { %v1226_v32 = vsel %vm1159_vm7, %v2955_v4, 0.0 }
 0x401   : > { %2679 = vmatprep.mubr.msk.f32.mxu0 %vm1159_vm7, %v1240_v5 }
 0x402   : > { %2680 = vmatmul.mubr.msk.f32.vlgmr.msra.gmra.mrb[6].mxu0 %vm1159_vm7, %v1241_v6  ;;  %v2549_v6 = vld [vmem:[%s3697_s27] ss:$0 sm:$0xff]  ;;  %s3701_s27 = sld [smem:[#allocation19_spill]] }
 0x403   : > { %1227 = vadd.xlane.f32.xlu1 %v1226_v32 }
 0x408   : > { %p3705_p2 = scmp.ne.s32.totalorder %s3701_s27, 0 }
 0x40a   : > { %p3042_p3 = pnand %p3041_p11, %p3705_p2 }
 0x40c   : > { %p3043_p4 = pneg %p3042_p3 }
 0x414   : > { %2932 = vrot.lane.b32.xlu1 %v3415_v37, %s3121_s14 }
 0x453   : > { %v1219_v34 = vpop.xlane.xlu0 %1218 }
 0x457   : > { %v1216_v7 = vpop.xlane.xlu1 %1215 }
 0x458   : > { %2956 = vrcp.f32 %v1216_v7 }
 0x459   : > { %2958 = vrcp.f32 %v1219_v34 }
 0x45b   : > { %v1222_v8 = vpop.xlane.xlu1 %1221  ;;  %v1225_v9 = vpop.xlane.xlu0 %1224 }
 0x45c   : > { %2960 = vrcp.f32 %v1222_v8 }
 0x45d   : > { %2962 = vrcp.f32 %v1225_v9 }
 0x45f   : > { %v2928_v10 = vpop.permute.xlu1 %2927  ;;  %v1231_v11 = vpop.xlane.xlu0 %1230 }
 0x460   : > { %v2930_v12 = vunpack.i.h.bf16 %v2928_v10  ;;  %v2929_v13 = vunpack.i.l.bf16 %v2928_v10  ;;  %2964 = vrcp.f32 %v1231_v11 }
 0x462   : > { %v2957_v14 = vpop.eup %2956  ;;  %v2793_v15 = vpack.c.bf16 %v2930_v12, %v2929_v13 }
 0x463   : > { %v2923_v16 = vpop.permute.xlu0 %2922  ;;  %v1242_v17 = vmul.f32 %v2957_v14, %v2943_v54  ;;  %v2959_v21 = vpop.eup %2958 }
 0x464   : > { %v2925_v19 = vunpack.i.h.bf16 %v2923_v16  ;;  %v2924_v37 = vunpack.i.l.bf16 %v2923_v16  ;;  %2794 = vmatprep.subr.bf16.mxu0 %v2793_v15  ;;  %v1243_v29 = vmul.f32 %v2959_v21, %v3461_v51 }
 0x465   : > { %2686 = vmatprep.mubr.msk.f32.mxu1 %vm1159_vm7, %v1242_v17  ;;  %2796 = vmatpush3.bf16.msra.mxu0 %v2793_v15 }
 0x466   : > { %v2961_v23 = vpop.eup %2960  ;;  %v2789_v24 = vpack.c.bf16 %v2925_v19, %v2924_v37  ;;  %2703 = vmatprep.subr.mxu0 %v1596_v18 }
 0x467   : > { %v2963_v25 = vpop.eup %2962  ;;  %v1244_v26 = vmul.f32 %v2961_v23, %v2945_v56 }
 0x468   : > { %v1245_v27 = vmul.f32 %v2963_v25, %v2947_v57  ;;  %2790 = vmatprep.subr.bf16.mxu1 %v2789_v24  ;;  %v1995_v25 = vld [vmem:[%s3359_s2 + $0x8] sm:$0xff] }
 0x469   : > { %2792 = vmatpush3.bf16.msra.mxu1 %v2789_v24  ;;  %2693 = vmatprep.mubr.msk.f32.mxu0 %vm1159_vm7, %v1244_v26  ;;  %v1994_v24 = vld [vmem:[%s3359_s2] sm:$0xff] }
 0x46a   : > { %2694 = vmatmul.mubr.msk.f32.vlgmr.msra.gmra.mrb[8].mxu0 %vm1159_vm7, %v1245_v27  ;;  %v2965_v36 = vpop.eup %2964  ;;  %v2801_v26 = vpack.c.bf16 %v1995_v25, %v1994_v24  ;;  %v1996_v27 = vld [vmem:[%s3359_s2 + $0x10] sm:$0xff] }
 0x46b   : > { %2704 = vmatpush3.msra.mxu0 %v1596_v18  ;;  %v1247_v40 = vmul.f32 %v2965_v36, %v3468_v60 }
 0x46c   : > { %2687 = vmatmul.mubr.msk.f32.vlgmr.msra.gmra.mrb[4].mxu1 %vm1159_vm7, %v1243_v29  ;;  %2713 = vmatprep.subr.mxu0 %v1598_v41  ;;  %v1997_v29 = vld [vmem:[%s3359_s2 + $0x18] sm:$0xff] }
 0x490   : > { %v1228_v30 = vpop.xlane.xlu1 %1227 }
 0x491   : > { %2966 = vrcp.f32 %v1228_v30  ;;  %v2805_v30 = vpack.c.bf16 %v1997_v29, %v1996_v27 }
 0x494   : > { %v2933_v31 = vpop.permute.xlu1 %2932 }
 0x495   : > { %v2935_v33 = vunpack.i.h.bf16 %v2933_v31  ;;  %v2934_v28 = vunpack.i.l.bf16 %v2933_v31 }
 0x497   : > { %v2797_v35 = vpack.c.bf16 %v2935_v33, %v2934_v28 }
 0x499   : > { %2798 = vmatprep.subr.bf16.mxu1 %v2797_v35 }
 0x49a   : > { %2800 = vmatpush3.bf16.msra.mxu1 %v2797_v35 }
 0x49b   : > { %v2967_v38 = vpop.eup %2966  ;;  %2708 = vmatprep.subr.mxu1 %v1597_v42 }
 0x49c   : > { %v1246_v39 = vmul.f32 %v2967_v38, %v2955_v4 }
 0x49e   : > { %2700 = vmatprep.mubr.msk.f32.mxu1 %vm1159_vm7, %v1246_v39 }
 0x49f   : > { %2701 = vmatmul.mubr.msk.f32.vlgmr.msra.gmra.mrb[6].mxu1 %vm1159_vm7, %v1247_v40  ;;  %v2550_v40 = vld [vmem:[%s3698_s15] ss:$0 sm:$0xff] }
 0x4a0   : > { %2709 = vmatpush3.msra.mxu1 %v1597_v42  ;;  %v2551_v42 = vld [vmem:[%s3699_s24] ss:$0 sm:$0xff]  ;;  %s3703_s24 = smov %s3702_s16 }
 0x4a1   : > { %2718 = vmatprep.subr.mxu1 %v1599_v43 }
 0x4d5   : > { %v2681_v44 = vpop.f32.mrb[6].mxu0 }
 0x4d6   : > { %v1326_v45 = vpop.f32.mrb[7].mxu0 }
 0x4d7   : > { %2705 = vmatprep.mubr.msk.f32.mxu0 %vm814_vm5, %v1326_v45 }
 0x4d8   : > { %2706 = vmatmul.mubr.msk.f32.vlgmr.msra.gmra.mrb[10].mxu0 %vm814_vm5, %v2681_v44 }
 0x4d9   : > { %2714 = vmatpush3.msra.mxu0 %v1598_v41 }
 0x4da   : > { %2802 = vmatprep.subr.bf16.mxu0 %v2801_v26 }
 0x53d   : > { %v2695_v46 = vpop.f32.mrb[8].mxu0 }
 0x53e   : > { %v1500_v47 = vpop.f32.mrb[9].mxu0 }
 0x53f   : > { %v2688_v48 = vpop.f32.mrb[4].mxu1  ;;  %2715 = vmatprep.mubr.msk.f32.mxu0 %vm814_vm5, %v1500_v47 }
 0x540   : > { %v1413_v49 = vpop.f32.mrb[5].mxu1  ;;  %2716 = vmatmul.mubr.msk.f32.vlgmr.msra.gmra.mrb[12].mxu0 %vm814_vm5, %v2695_v46 }
 0x541   : > { %2710 = vmatprep.mubr.msk.f32.mxu1 %vm814_vm5, %v1413_v49  ;;  %2804 = vmatpush3.bf16.msra.mxu0 %v2801_v26  ;;  %v2140_v49 = vld [vmem:[%s3369_s1] sm:$0xff] }
 0x542   : > { %2711 = vmatmul.mubr.msk.f32.vlgmr.msra.gmra.mrb[8].mxu1 %vm814_vm5, %v2688_v48  ;;  %2806 = vmatprep.subr.bf16.mxu0 %v2805_v30 }
 0x543   : > { %2719 = vmatpush3.msra.mxu1 %v1599_v43 }
 0x545   : > { %2808 = vmatpush3.bf16.msra.mxu0 %v2805_v30 }
 0x572   : > { %v2702_v50 = vpop.f32.mrb[6].mxu1 }
 0x573   : > { %v1587_v51 = vpop.f32.mrb[7].mxu1 }
 0x574   : > { %2720 = vmatprep.mubr.msk.f32.mxu1 %vm814_vm5, %v1587_v51 }
 0x575   : > { %2721 = vmatmul.mubr.msk.f32.vlgmr.msra.gmra.mrb[10].mxu1 %vm814_vm5, %v2702_v50  ;;  %v2141_v50 = vld [vmem:[%s3369_s1 + $0x8] sm:$0xff] }
 0x576   : > { %v2809_v51 = vpack.c.bf16 %v2141_v50, %v2140_v49 }
 0x578   : > { %2810 = vmatprep.subr.bf16.mxu1 %v2809_v51 }
 0x579   : > { %2812 = vmatpush3.bf16.msra.mxu1 %v2809_v51 }
 0x5ab   : > { %v2707_v52 = vpop.f32.mrb[10].mxu0 }
 0x5ac   : > { %v1672_v53 = vpop.f32.mrb[11].mxu0  ;;  %v1931_v57 = vsel %vm714_vm4, %v2707_v52, 0.0  ;;  %v2142_v52 = vld [vmem:[%s3369_s1 + $0x10] sm:$0xff] }
 0x5ad   : > { %v1924_v60 = vsel %vm714_vm4, %v1672_v53, 0.0  ;;  %v2143_v53 = vld [vmem:[%s3369_s1 + $0x18] sm:$0xff] }
 0x613   : > { %v2717_v54 = vpop.f32.mrb[12].mxu0 }
 0x614   : > { %v1834_v55 = vpop.f32.mrb[13].mxu0  ;;  %v1934_v63 = vsel %vm714_vm4, %v2717_v54, 0.0  ;;  %v2813_v54 = vpack.c.bf16 %v2143_v53, %v2142_v52 }
 0x615   : > { %v2712_v56 = vpop.f32.mrb[8].mxu1  ;;  %v1927_v1 = vsel %vm714_vm4, %v1834_v55, 0.0  ;;  %v2144_v55 = vld [vmem:[%s3369_s1 + $0x20] sm:$0xff] }
 0x616   : > { %v1932_v58 = vsel %vm714_vm4, %v2712_v56, 0.0  ;;  %v1753_v59 = vpop.f32.mrb[9].mxu1  ;;  %2814 = vmatprep.subr.bf16.mxu1 %v2813_v54  ;;  %v2145_v56 = vld [vmem:[%s3369_s1 + $0x28] sm:$0xff] }
 0x617   : > { %v1933_v61 = vadd.f32 %v1932_v58, %v1931_v57  ;;  %v1925_v62 = vsel %vm714_vm4, %v1753_v59, 0.0  ;;  %2816 = vmatpush3.bf16.msra.mxu1 %v2813_v54  ;;  %v2817_v57 = vpack.c.bf16 %v2145_v56, %v2144_v55  ;;  %v2146_v58 = vld [vmem:[%s3369_s1 + $0x30] sm:$0xff]  ;;  %v2147_v59 = vld [vmem:[%s3369_s1 + $0x38] sm:$0xff]  ;;  %v2557_v56 = vld [vmem:[%s659_s26] ss:$0 sm:$0xff]  ;;  %s3046_s1 = scalar_lea.vmem %s3045_s18, 512 }
 0x618   : > { %v1926_v0 = vadd.f32 %v1925_v62, %v1924_v60  ;;  %v2821_v60 = vpack.c.bf16 %v2147_v59, %v2146_v58  ;;  %p3048_p8 = scmp.lt.s32.totalorder %s3046_s1, %s3040_s20 }
 0x619   : > { %v1935_v2 = vadd.f32 %v1934_v63, %v1933_v61  ;;  %2818 = vmatprep.subr.bf16.mxu1 %v2817_v57  ;;  %v2552_v61 = vld [vmem:[%s651_s4] ss:$0 sm:$0xff] }
 0x61a   : > { %v1928_v3 = vadd.f32 %v1927_v1, %v1926_v0  ;;  %p3049_p12 = por %p3048_p8, %p3047_p7 }
 0x61b   : > { %2820 = vmatpush3.bf16.msra.mxu1 %v2817_v57 }
 0x61c   : > { %2822 = vmatprep.subr.bf16.mxu1 %v2821_v60  ;;  %p3050_p0 = pnand %p3049_p12, %p3043_p4 }
 0x61f   : > { %2824 = vmatpush3.bf16.msra.mxu1 %v2821_v60 }
 0x648   : > { %v2722_v4 = vpop.f32.mrb[10].mxu1 }
 0x649   : > { %v1936_v5 = vsel %vm714_vm4, %v2722_v4, 0.0  ;;  %v1915_v32 = vpop.f32.mrb[11].mxu1 }
 0x64a   : > { %v1937_v34 = vadd.f32 %v1936_v5, %v1935_v2  ;;  %v1929_v7 = vsel %vm714_vm4, %v1915_v32, 0.0 }
 0x64b   : > { %v1930_v8 = vadd.f32 %v1929_v7, %v1928_v3 }
 0x64c   : > { %v1946_v9 = vadd.f32 %v2549_v6, %v1937_v34 }
 0x64d   : > { %v1945_v10 = vadd.f32 %v2549_v6, %v1930_v8 }
 0x64e   : > { %v1948_v11 = vadd.f32 %v1946_v9, %v3395_v22 }
 0x64f   : > { %v1947_v12 = vadd.f32 %v1945_v10, %v3391_v20 }
 0x650   : > { %v1954_v13 = vsel %vm714_vm4, %v1948_v11, 0.0 }
 0x651   : > { %1955 = vadd.xlane.f32.xlu1 %v1954_v13  ;;  %v1951_v14 = vsel %vm714_vm4, %v1947_v12, 0.0 }
 0x652   : > { %1952 = vadd.xlane.f32.xlu0 %v1951_v14 }
 0x6de   : > { %v1956_v15 = vpop.xlane.xlu1 %1955 }
 0x6df   : > { %v1959_v16 = vmul.f32 0.03125, %v1956_v15  ;;  %v1953_v17 = vpop.xlane.xlu0 %1952 }
 0x6e0   : > { %v1958_v18 = vmul.f32 0.03125, %v1953_v17 }
 0x6e1   : > { %v1961_v19 = vsub.f32 %v1948_v11, %v1959_v16 }
 0x6e2   : > { %v1960_v37 = vsub.f32 %v1947_v12, %v1958_v18 }
 0x6e3   : > { %v1963_v20 = vmul.f32 %v1961_v19, %v1961_v19 }
 0x6e4   : > { %v1962_v21 = vmul.f32 %v1960_v37, %v1960_v37 }
 0x6e5   : > { %v1967_v23 = vsel %vm714_vm4, %v1963_v20, 0.0 }
 0x6e6   : > { %v1964_v22 = vsel %vm714_vm4, %v1962_v21, 0.0 }
 0x6e7   : > { %1965 = vadd.xlane.f32.xlu0 %v1964_v22 }
 0x6eb   : > { %1968 = vadd.xlane.f32.xlu0 %v1967_v23 }
 0x774   : > { %v1966_v31 = vpop.xlane.xlu0 %1965 }
 0x775   : > { %v1970_v33 = vmul.f32 0.03125, %v1966_v31 }
 0x777   : > { %v1972_v28 = vadd.f32 1e-05, %v1970_v33 }
 0x778   : > { %v1969_v35 = vpop.xlane.xlu0 %1968 }
 0x779   : > { %2968 = vrsqrt.f32 %v1972_v28  ;;  %v1971_v36 = vmul.f32 0.03125, %v1969_v35 }
 0x77b   : > { %v1973_v38 = vadd.f32 1e-05, %v1971_v36 }
 0x77d   : > { %2970 = vrsqrt.f32 %v1973_v38 }
 0x783   : > { %v2969_v39 = vpop.eup %2968 }
 0x784   : > { %v1976_v41 = vmul.f32 %v2969_v39, %v1960_v37 }
 0x786   : > { %v1984_v43 = vmul.f32 %v2550_v40, %v1976_v41  ;;  %v3122_v41 = vmov -1.0  }
 0x787   : > { %v2971_v44 = vpop.eup %2970 }
 0x788   : > { %v1977_v45 = vmul.f32 %v2971_v44, %v1961_v19  ;;  %v3535_v46 = vadd.f32 %v2551_v42, %v1984_v43 }
 0x78a   : > { %v1985_v47 = vmul.f32 %v2550_v40, %v1977_v45  ;;  %2731 = vmatprep.mubr.msk.f32.mxu0 %vm714_vm4, %v3535_v46 }
 0x78c   : > { %v3539_v48 = vadd.f32 %v2551_v42, %v1985_v47 }
 0x78e   : > { %2732 = vmatmul.mubr.msk.f32.vlgmr.msra.gmra.mrb[14].mxu0 %vm714_vm4, %v3539_v48 }
 0x861   : > { %v2733_v62 = vpop.f32.mrb[14].mxu0 }
 0x862   : > { %v2083_v63 = vadd.f32 %v2733_v62, %v2552_v61  ;;  %v2077_v0 = vpop.f32.mrb[15].mxu0 }
 0x863   : > { %v2078_v1 = vadd.f32 %v2552_v61, %v2077_v0 }
 0x864   : > { %v2089_v2 = vmul.f32 0.70710677, %v2083_v63  ;;  %v2087_v52 = vmul.f32 0.5, %v2083_v63 }
 0x865   : > { %v2088_v3 = vmul.f32 0.70710677, %v2078_v1  ;;  %v2086_v50 = vmul.f32 0.5, %v2078_v1 }
 0x866   : > { %v2095_v4 = vand.u32 2147483647, %v2089_v2  ;;  %vm2091_vm8 = vcmp.ge.f32.partialorder %v2089_v2, 0.0 }
 0x867   : > { %v2094_v5 = vand.u32 2147483647, %v2088_v3  ;;  %vm2090_vm9 = vcmp.ge.f32.partialorder %v2088_v3, 0.0  ;;  %v2093_v42 = vsel %vm2091_vm8, 1.0, %v3122_v41 }
 0x868   : > { %v2097_v6 = vmul.f32 0.3275911, %v2095_v4  ;;  %v2123_v8 = vsub.f32 0.0, %v2095_v4  ;;  %v2092_v45 = vsel %vm2090_vm9, 1.0, %v3122_v41 }
 0x869   : > { %v2096_v32 = vmul.f32 0.3275911, %v2094_v5  ;;  %v2122_v9 = vsub.f32 0.0, %v2094_v5 }
 0x86a   : > { %v2099_v34 = vadd.f32 1.0, %v2097_v6  ;;  %v2125_v11 = vmul.f32 %v2123_v8, %v2095_v4 }
 0x86b   : > { %v2098_v7 = vadd.f32 1.0, %v2096_v32  ;;  %v2124_v14 = vmul.f32 %v2122_v9, %v2094_v5 }
 0x86c   : > { %2972 = vrcp.f32 %v2099_v34  ;;  %v2128_v17 = vmul.f32 1.442695, %v2125_v11 }
 0x86d   : > { %2974 = vrcp.f32 %v2098_v7  ;;  %v2126_v37 = vmul.f32 1.442695, %v2124_v14 }
 0x86e   : > { %2976 = vpow2.f32 %v2128_v17  ;;  %v2559_v17 = vld [vmem:[%s665_s30] ss:$0 sm:$0xff]  ;;  %s3704_s30 = sand.u32 1, %s3700_s23  }
 0x86f   : > { %2978 = vpow2.f32 %v2126_v37  ;;  %s3594_s17 = scalar_lea.sflag [#allocation6], %s3704_s30 }
 0x876   : > { %v2973_v10 = vpop.eup %2972 }
 0x877   : > { %v2975_v12 = vpop.eup %2974  ;;  %v2105_v13 = vmul.f32 1.0614054, %v2973_v10 }
 0x878   : > { %v2104_v15 = vmul.f32 1.0614054, %v2975_v12  ;;  %v2977_v28 = vpop.eup %2976 }
 0x879   : > { %v2107_v16 = vadd.f32 -1.4531521, %v2105_v13  ;;  %v2979_v36 = vpop.eup %2978  ;;  %v2558_v13 = vld [vmem:[%s662_s19] ss:$0 sm:$0xff]  ;;  %s3582_s19 = scalar_lea.hbm %s3702_s16, %s2569_s25 }
 0x87a   : > { %v2106_v18 = vadd.f32 -1.4531521, %v2104_v15 }
 0x87b   : > { %v2109_v19 = vmul.f32 %v2973_v10, %v2107_v16 }
 0x87c   : > { %v2108_v21 = vmul.f32 %v2975_v12, %v2106_v18 }
 0x87d   : > { %v2111_v22 = vadd.f32 1.4214138, %v2109_v19 }
 0x87e   : > { %v2110_v20 = vadd.f32 1.4214138, %v2108_v21 }
 0x87f   : > { %v2113_v23 = vmul.f32 %v2973_v10, %v2111_v22 }
 0x880   : > { %v2112_v24 = vmul.f32 %v2975_v12, %v2110_v20 }
 0x881   : > { %v2115_v25 = vadd.f32 -0.28449672, %v2113_v23 }
 0x882   : > { %v2114_v26 = vadd.f32 -0.28449672, %v2112_v24 }
 0x883   : > { %v2117_v27 = vmul.f32 %v2973_v10, %v2115_v25 }
 0x884   : > { %v2116_v29 = vmul.f32 %v2975_v12, %v2114_v26 }
 0x885   : > { %v2119_v30 = vadd.f32 0.2548296, %v2117_v27 }
 0x886   : > { %v2118_v31 = vadd.f32 0.2548296, %v2116_v29 }
 0x887   : > { %v2121_v33 = vmul.f32 %v2973_v10, %v2119_v30 }
 0x888   : > { %v2120_v35 = vmul.f32 %v2975_v12, %v2118_v31 }
 0x889   : > { %v2131_v38 = vmul.f32 %v2977_v28, %v2121_v33 }
 0x88a   : > { %v2130_v39 = vmul.f32 %v2979_v36, %v2120_v35 }
 0x88b   : > { %v2133_v40 = vsub.f32 1.0, %v2131_v38 }
 0x88c   : > { %v2132_v43 = vsub.f32 1.0, %v2130_v39 }
 0x88d   : > { %v2135_v44 = vmul.f32 %v2133_v40, %v2093_v42 }
 0x88e   : > { %v2134_v47 = vmul.f32 %v2132_v43, %v2092_v45 }
 0x88f   : > { %v2137_v49 = vadd.f32 1.0, %v2135_v44 }
 0x890   : > { %v2136_v51 = vadd.f32 1.0, %v2134_v47 }
 0x891   : > { %v2139_v54 = vmul.f32 %v2137_v49, %v2087_v52 }
 0x892   : > { %v2138_v53 = vmul.f32 %v2136_v51, %v2086_v50 }
 0x894   : > { %2750 = vmatprep.mubr.msk.f32.mxu1 %vm2148_vm10, %v2138_v53 }
 0x895   : > { %2751 = vmatmul.mubr.msk.f32.vlgmr.msra.gmra.mrb[12].mxu1 %vm2148_vm10, %v2139_v54 }
 0x968   : > { %v2752_v55 = vpop.f32.mrb[12].mxu1 }
 0x969   : > { %v2231_v57 = vadd.f32 %v2752_v55, %v3539_v48  ;;  %v2221_v58 = vpop.f32.mrb[13].mxu1 }
 0x96a   : > { %v2230_v59 = vadd.f32 %v2221_v58, %v3535_v46 }
 0x96b   : > { %v2240_v60 = vadd.f32 %v2557_v56, %v2231_v57 }
 0x96c   : > { %v2239_v61 = vadd.f32 %v2557_v56, %v2230_v59 }
 0x96d   : > { %v2246_v62 = vsel %vm714_vm4, %v2240_v60, 0.0 }
 0x96e   : > { %2247 = vadd.xlane.f32.xlu0 %v2246_v62  ;;  %v2243_v63 = vsel %vm714_vm4, %v2239_v61, 0.0 }
 0x96f   : > { %2244 = vadd.xlane.f32.xlu1 %v2243_v63 }
 0x9fb   : > { %v2248_v0 = vpop.xlane.xlu0 %2247 }
 0x9fc   : > { %v2250_v1 = vmul.f32 0.03125, %v2248_v0  ;;  %v2245_v2 = vpop.xlane.xlu1 %2244 }
 0x9fd   : > { %v2249_v3 = vmul.f32 0.03125, %v2245_v2 }
 0x9fe   : > { %v2252_v4 = vsub.f32 %v2240_v60, %v2250_v1 }
 0x9ff   : > { %v2251_v5 = vsub.f32 %v2239_v61, %v2249_v3 }
 0xa00   : > { %v2254_v6 = vmul.f32 %v2252_v4, %v2252_v4 }
 0xa01   : > { %v2253_v48 = vmul.f32 %v2251_v5, %v2251_v5 }
 0xa02   : > { %v2258_v32 = vsel %vm714_vm4, %v2254_v6, 0.0 }
 0xa03   : > { %2259 = vadd.xlane.f32.xlu0 %v2258_v32  ;;  %v2255_v46 = vsel %vm714_vm4, %v2253_v48, 0.0 }
 0xa04   : > { %2256 = vadd.xlane.f32.xlu1 %v2255_v46 }
 0xa90   : > { %v2260_v34 = vpop.xlane.xlu0 %2259 }
 0xa91   : > { %v2262_v7 = vmul.f32 0.03125, %v2260_v34  ;;  %v2257_v8 = vpop.xlane.xlu1 %2256 }
 0xa92   : > { %v2261_v9 = vmul.f32 0.03125, %v2257_v8 }
 0xa93   : > { %v2264_v10 = vadd.f32 1e-05, %v2262_v7 }
 0xa94   : > { %v2263_v11 = vadd.f32 1e-05, %v2261_v9 }
 0xa95   : > { %2980 = vrsqrt.f32 %v2264_v10 }
 0xa96   : > { %2982 = vrsqrt.f32 %v2263_v11 }
 0xa9f   : > { %v2981_v12 = vpop.eup %2980 }
 0xaa0   : > { %v2983_v14 = vpop.eup %2982  ;;  %v2268_v15 = vmul.f32 %v2981_v12, %v2252_v4 }
 0xaa1   : > { %v2267_v16 = vmul.f32 %v2983_v14, %v2251_v5 }
 0xaa2   : > { %v2276_v18 = vmul.f32 %v2558_v13, %v2268_v15 }
 0xaa3   : > { %v2275_v19 = vmul.f32 %v2558_v13, %v2267_v16 }
 0xaa4   : > { %v2284_v37 = vadd.f32 %v2559_v17, %v2276_v18 }
 0xaa5   : > { %v2283_v21 = vadd.f32 %v2559_v17, %v2275_v19 }
 0xaa6   : > { %2286 = vst.msk [vmem:[#allocation2 + $0x8] sm:$0xff] %vm714_vm4, %v2284_v37  ;;  %2288 = vst.msk [vmem:[%s3383_s22 + $0x8] sm:$0xff] %vm714_vm4, %v2284_v37 }
 0xaa7   : > { %2285 = vst.msk [vmem:[#allocation2] sm:$0xff] %vm714_vm4, %v2283_v21  ;;  %2287 = vst.msk [vmem:[%s3383_s22] sm:$0xff] %vm714_vm4, %v2283_v21 }
 0xaa8   : > { %3053 = shalt.err (!%p3050_p0)
}
 0xaa9   : > { %s3054_s22 = scalar_lea.hbm %s3582_s19, 256  ;;  %s3058_s14 = scalar_lea.hbm %s3703_s24, 512 }
 0xaaa   : > { %p3055_p1 = scmp.ne.s32.totalorder %s3582_s19, %s3054_s22  ;;  %p3059_p9 = scmp.lt.u32.totalorder %s3582_s19, %s3703_s24 }
 0xaab   : > { %p3060_p13 = scmp.lt.u32.totalorder %s3058_s14, %s3054_s22  ;;  %p3062_p11 = scmp.lt.u32.totalorder %s3054_s22, %s3582_s19 }
 0xaac   : > { %p3056_p6 = pnand %p3055_p1, %p3705_p2 }
 0xaad   : > { %p3061_p10 = por %p3060_p13, %p3059_p9 }
 0xaae   : > { %p3057_p5 = pneg %p3056_p6 }
 0xaaf   : > { %p3063_p3 = por %p3062_p11, %p3061_p10 }
 0xab1   : > { %p3064_p4 = pnand %p3063_p3, %p3057_p5 }
 0xab3   : > { %3067 = shalt.err (!%p3064_p4)
}
 0xab4   : > { %s3124_s21 = smov 128   ;;  %s3125_s25 = smov 8  }
 0xab5   : > { %2833 = dma.vmem_to_hbm [thread:$0]  (%p3705_p2), %s3584_s29, 256, %s3582_s19, %s3594_s17, %s3124_s21, %s3124_s21, %s3125_s25  }
 0xab6 PF: > { %s3706_s15 = sld [smem:[#allocation16_spill]]  ;;  %s3707_s2 = sld [smem:[#allocation13_spill]] }
 0xab7   : > { %s3708_s16 = sld [smem:[#allocation20_spill]] }
 0xabc   : > { %p2850_p7 = scmp.ge.s32.totalorder %s3706_s15, 2  ;;  %s2318_s30 = sand.u32 1, %s3707_s2  }
 0xabd   : > { %p3709_p8 = scmp.ne.s32.totalorder %s3708_s16, 0  ;;  %s2319_s20 = scalar_lea.sflag [#allocation6], %s2318_s30 }
 0xabf   : > { %p2843_p12 = pnand %p2850_p7, %p3709_p8 }
 0xac1   : > { %3093 = dma.done.wait (!%p2843_p12), %s2319_s20, 256  }
 0xac2   : > { %3095 = vsyncadd (!%p2843_p12), %s2319_s20, 4294967040  ;;  %s3710_s16 = sld [smem:[#allocation17_spill]]  ;;  %s3711_s29 = sld [smem:[#allocation14_spill]] }
 0xac3   : > { %s3712_s30 = sld [smem:[#allocation15_spill]]  ;;  %s3713_s15 = sld [smem:[#allocation18_spill]] }
 0xac8   : > { %p26_p0 = scmp.ge.s32.totalorder %s3710_s16, 4  }
 0xaca   :  { %28 = sbr.rel (!%p26_p0) target bundleno = 11 (0xb), region = 157 }
 0xad1   :  { %2324 = vsyncpa [#allocation5], 1 }
 0xad2   :  { %2326 = vsyncpa [#allocation5 + $0x1], 1 }
 0xad3   :  { %2327 = vsyncpa [#allocation8], 1 }
 0xad4   :  { %2328 = vsyncpa [#allocation6], 1 }
 0xad5   :  { %2330 = vsyncpa [#allocation6 + $0x1], 1 }

</bundles_post_ra>
